<compile_context>
chip_gen: v7x
topology: tpu7x:2x2x1
jax: 0.10.0
libtpu: 0.0.40
codegen_flags: <defaults>
</compile_context>

<pallas_src>
import jax
import jax.numpy as jnp
from jax.experimental import pallas as pl
from jax.experimental.pallas import tpu as pltpu

_C0 = 0.7978845608028654  # sqrt(2/pi)
_C1 = 0.044715

_BYPASS_BYTES = 1 << 18   # < 256 KiB: fused XLA elementwise beats any pallas_call
_BLOCK_BYTES = 4 << 20    # ~4 MiB per block (row count derived per dtype below)
_WIDE_LANES = 512         # preferred lane-dense last dim
_MIN_LANES = 128


def _gelu_tanh_kernel(x_ref, o_ref):
    # Keep math in f32 (single up/downcast) so bf16 inputs on v5e don't pay
    # per-op converts; tanh goes to the EUP slot, the rest is VPU filler on a
    # kernel that is purely HBM-bandwidth bound anyway.
    x = x_ref[...].astype(jnp.float32)
    x2 = x * x
    inner = (x * (1.0 + _C1 * x2)) * _C0
    out = (0.5 * x) * (jnp.tanh(inner) + 1.0)
    o_ref[...] = out.astype(o_ref.dtype)


def _gelu_tanh_ref(x):
    # Mirrors the PyTorch forward op-for-op.
    v2 = x * 0.5
    v3 = x * x * x
    v4 = v3 * _C1
    v5 = x + v4
    v6 = v5 * _C0
    v7 = jnp.tanh(v6)
    v8 = v7 + 1.0
    return v2 * v8


def model_forward(x1):
    """Pallas implementation of Model.forward (Flatten is an identity here)."""
    # TODO(synk): in PyTorch, Flatten(start_dim=4) on a 4-D tensor raises a
    # dim-out-of-range error; we interpret it as the identity.
    orig_shape = x1.shape
    dtype = x1.dtype
    total = x1.size
    itemsize = jnp.dtype(dtype).itemsize

    # --- tiny-input bypass: fused XLA op is strictly faster -----------------
    if total * itemsize < _BYPASS_BYTES:
        return _gelu_tanh_ref(x1)

    # --- lane-dense 2-D layout ----------------------------------------------
    flat = x1.reshape(-1)
    if total % _WIDE_LANES == 0:
        lanes = _WIDE_LANES
        padded_len = total
    elif total % _MIN_LANES == 0:
        lanes = _MIN_LANES
        padded_len = total
    else:
        lanes = _MIN_LANES
        padded_len = ((total + _MIN_LANES - 1) // _MIN_LANES) * _MIN_LANES
        flat = jnp.pad(flat, (0, padded_len - total))

    rows = padded_len // lanes
    x2d = flat.reshape(rows, lanes)

    # dtype-aware block row count: keep block bytes ~constant so bf16 doesn't
    # halve the per-step payload.  Multiple of 8 for sublane tiling.
    block_rows = max(8, (_BLOCK_BYTES // (lanes * itemsize)) // 8 * 8)

    if rows <= block_rows:
        # Single block == full array: no grid, no per-step pipeline overhead.
        out2d = pl.pallas_call(
            _gelu_tanh_kernel,
            out_shape=jax.ShapeDtypeStruct((rows, lanes), dtype),
            in_specs=[pl.BlockSpec((rows, lanes), lambda: (0, 0))],
            out_specs=pl.BlockSpec((rows, lanes), lambda: (0, 0)),
        )(x2d)
    else:
        # 1-D grid over rows.  The ragged last block is handled by Pallas
        # (out-of-extent writes masked) -- no pad-to-tile copy needed.
        out2d = pl.pallas_call(
            _gelu_tanh_kernel,
            out_shape=jax.ShapeDtypeStruct((rows, lanes), dtype),
            grid=(pl.cdiv(rows, block_rows),),
            in_specs=[pl.BlockSpec((block_rows, lanes), lambda i: (i, 0))],
            out_specs=pl.BlockSpec((block_rows, lanes), lambda i: (i, 0)),
            compiler_params=pltpu.CompilerParams(
                dimension_semantics=("parallel",),   # v7x: split across both TCs
                vmem_limit_bytes=32 << 20,           # 16 MiB resident, safe everywhere
            ),
        )(x2d)

    if padded_len != total:
        return out2d.reshape(-1)[:total].reshape(orig_shape)
    return out2d.reshape(orig_shape)


if __name__ == "__main__":
    key = jax.random.PRNGKey(0)
    k1, k2, k3 = jax.random.split(key, 3)

    # Shape from the original module (takes the small-size bypass path).
    x_small = jax.random.normal(k1, (4, 4, 4, 4), dtype=jnp.float32)
    # 512 KiB: exercises the single-block Pallas path.
    x_med = jax.random.normal(k2, (4, 8, 64, 64), dtype=jnp.float32)
    # 8 MiB: exercises the gridded Pallas path (2 parallel grid steps).
    x_big = jax.random.normal(k3, (8, 16, 128, 128), dtype=jnp.float32)

    ok = True
    for x in (x_small, x_med, x_big):
        out = model_forward(x)
        jax.block_until_ready(out)
        ref = _gelu_tanh_ref(x)
        ok = ok and (out.shape == x.shape)
        ok = ok and bool(jnp.allclose(out, ref, atol=2e-5, rtol=2e-5))
    assert ok
    print("KERNEL_OK")
</pallas_src>

<mosaic_0001>
module attributes {stable_mosaic.version = 11 : i64} {
  func.func @_gelu_tanh_kernel(%arg0: memref<256x512xf32, #tpu.memory_space<vmem>>, %arg1: memref<256x512xf32, #tpu.memory_space<vmem>>) attributes {dimension_semantics = [], scalar_prefetch = 0 : i64, scratch_operands = 0 : i64, tpu.core_type = #tpu.core_type<tc>} {
    %c0 = arith.constant 0 : index
    %c0_0 = arith.constant 0 : index
    %0 = vector.load %arg0[%c0, %c0_0] : memref<256x512xf32, #tpu.memory_space<vmem>>, vector<256x512xf32>
    %1 = arith.mulf %0, %0 : vector<256x512xf32>
    %cst = arith.constant 4.471500e-02 : f32
    %2 = vector.broadcast %cst : f32 to vector<256x512xf32>
    %3 = arith.mulf %2, %1 : vector<256x512xf32>
    %cst_1 = arith.constant 1.000000e+00 : f32
    %4 = vector.broadcast %cst_1 : f32 to vector<256x512xf32>
    %5 = arith.addf %4, %3 : vector<256x512xf32>
    %6 = arith.mulf %0, %5 : vector<256x512xf32>
    %cst_2 = arith.constant 0.797884583 : f32
    %7 = vector.broadcast %cst_2 : f32 to vector<256x512xf32>
    %8 = arith.mulf %6, %7 : vector<256x512xf32>
    %cst_3 = arith.constant 5.000000e-01 : f32
    %9 = vector.broadcast %cst_3 : f32 to vector<256x512xf32>
    %10 = arith.mulf %9, %0 : vector<256x512xf32>
    %11 = math.tanh %8 : vector<256x512xf32>
    %cst_4 = arith.constant 1.000000e+00 : f32
    %12 = vector.broadcast %cst_4 : f32 to vector<256x512xf32>
    %13 = arith.addf %11, %12 : vector<256x512xf32>
    %14 = arith.mulf %10, %13 : vector<256x512xf32>
    %c0_5 = arith.constant 0 : index
    %c0_6 = arith.constant 0 : index
    %15 = vector.load %arg1[%c0_5, %c0_6] : memref<256x512xf32, #tpu.memory_space<vmem>>, vector<256x512xf32>
    tpu.vector_store %arg1[%c0_5, %c0_6], %14 {strides = array<i32>} : memref<256x512xf32, #tpu.memory_space<vmem>>, vector<256x512xf32>,
    return
  }
}

</mosaic_0001>

<bundles_post_ra>
// kernel: tpu_custom_call.1
= control target key start
LH: loop header
LB: loop body
LE: loop exit
PB: predicated region body
PF: predicated region fallthrough
CT: control target
= control target key end

     0   :  { %6 = vsyncpa [#allocation3], 0  ;;  %s2556_s0 = inlined_call_operand.hbm [shape: f32[256,512], index: 0, kind: input, shape index: {}]   ;;  %s2557_s1 = inlined_call_operand.hbm [shape: f32[256,512], index: 1, kind: output, shape index: {}]  }
   0x1   :  { %7 = vsyncpa [#allocation4], 0  ;;  %s1756_s6 = smov [#allocation2]   ;;  %s1708_s10 = scalar_lea.hbm %s2556_s0, 16384 }
   0x2   :  { %s13_s7 = sshll.u32 %s1756_s6, 4  ;;  %p1709_p0 = scmp.ne.s32.totalorder %s2556_s0, %s1708_s10  ;;  %s14_s7 = int_to_ptr.vmem [resolvable:$true] %s13_s7 }
   0x3   :  { %p1712_p1 = scmp.lt.u32.totalorder %s1708_s10, %s2556_s0 }
   0x5   :  { %p1714_p2 = pnand %p1712_p1, %p1709_p0 }
   0x7   :  { %1717 = shalt.err (!%p1714_p2)
}
   0x8   :  { %s1718_s15 = scalar_lea.vmem %s14_s7, 16384  ;;  %p1723_p4 = scmp.lt.s32.totalorder %s14_s7, %s14_s7 }
   0x9   :  { %p1719_p3 = scmp.ne.s32.totalorder %s14_s7, %s1718_s15  ;;  %p1724_p5 = scmp.lt.s32.totalorder %s1718_s15, %s1718_s15 }
   0xb   :  { %p1725_p6 = por %p1724_p5, %p1723_p4 }
   0xd   :  { %p1726_p7 = pnand %p1725_p6, %p1719_p3 }
   0xf   :  { %1729 = shalt.err (!%p1726_p7)
}
  0x10   :  { %s1757_s16 = smov 512   ;;  %s1758_s17 = smov 32  }
  0x11   :  { %19 = dma.hbm_to_vmem [thread:$0]  %s2556_s0, 16384, %s14_s7, [#allocation3], %s1757_s16, %s1757_s16, %s1758_s17  }
  0x12   :  { %1752 = dma.done.wait [#allocation3], 16384  }
  0x13   :  { %1753 = vsyncadd [#allocation3], 4294950912  ;;  %v23_v0 = vld [vmem:[#allocation2] sm:$0xff]  ;;  %v24_v1 = vld [vmem:[#allocation2 + $0x8] sm:$0xff]  ;;  %s1759_s0 = smov [#allocation5]  }
  0x14   :  { %v25_v2 = vld [vmem:[#allocation2 + $0x10] sm:$0xff]  ;;  %v151_v3 = vmul.f32 %v23_v0, %v23_v0  ;;  %v152_v4 = vmul.f32 %v24_v1, %v24_v1  ;;  %v26_v5 = vld [vmem:[#allocation2 + $0x18] sm:$0xff]  ;;  %v27_v6 = vld [vmem:[#allocation2 + $0x20] sm:$0xff]  ;;  %v1795_v22 = vmul.f32 0.5, %v23_v0  ;;  %v1804_v44 = vmul.f32 0.5, %v24_v1  ;;  %s1436_s20 = sshll.u32 %s1759_s0, 4  ;;  %s1437_s20 = int_to_ptr.vmem [resolvable:$true] %s1436_s20 }
  0x15   :  { %v1785_v7 = vld [vmem:[#allocation2 + $0x28] sm:$0xff]  ;;  %v153_v8 = vmul.f32 %v25_v2, %v25_v2  ;;  %v154_v9 = vmul.f32 %v26_v5, %v26_v5  ;;  %v1787_v10 = vld [vmem:[#allocation2 + $0x30] sm:$0xff]  ;;  %v155_v13 = vmul.f32 %v27_v6, %v27_v6  ;;  %v1793_v21 = vld [vmem:[#allocation2 + $0x38] sm:$0xff]  ;;  %v1811_v51 = vmul.f32 0.5, %v25_v2  ;;  %s1730_s21 = scalar_lea.vmem %s1437_s20, 16384  ;;  %p1735_p9 = scmp.lt.s32.totalorder %s1437_s20, %s1437_s20 }
  0x16   :  { %v279_v11 = vmul.f32 0.044715, %v151_v3  ;;  %v280_v12 = vmul.f32 0.044715, %v152_v4  ;;  %v156_v16 = vmul.f32 %v1785_v7, %v1785_v7  ;;  %v157_v20 = vmul.f32 %v1787_v10, %v1787_v10  ;;  %v1799_v34 = vld [vmem:[#allocation2 + $0x40] sm:$0xff]  ;;  %v1801_v39 = vld [vmem:[#allocation2 + $0x48] sm:$0xff]  ;;  %p1731_p8 = scmp.ne.s32.totalorder %s1437_s20, %s1730_s21  ;;  %p1736_p10 = scmp.lt.s32.totalorder %s1730_s21, %s1730_s21 }
  0x17   :  { %v281_v14 = vmul.f32 0.044715, %v153_v8  ;;  %v282_v15 = vmul.f32 0.044715, %v154_v9  ;;  %v283_v19 = vmul.f32 0.044715, %v155_v13  ;;  %v158_v33 = vmul.f32 %v1793_v21, %v1793_v21 }
  0x18   :  { %v407_v17 = vadd.f32 1.0, %v279_v11  ;;  %v408_v18 = vadd.f32 1.0, %v280_v12  ;;  %v284_v25 = vmul.f32 0.044715, %v156_v16  ;;  %v285_v29 = vmul.f32 0.044715, %v157_v20  ;;  %p1737_p11 = por %p1736_p10, %p1735_p9 }
  0x19   :  { %v409_v23 = vadd.f32 1.0, %v281_v14  ;;  %v410_v24 = vadd.f32 1.0, %v282_v15  ;;  %v411_v28 = vadd.f32 1.0, %v283_v19  ;;  %v286_v43 = vmul.f32 0.044715, %v158_v33  ;;  %v1809_v50 = vld [vmem:[#allocation2 + $0x50] sm:$0xff] }
  0x1a   :  { %v535_v26 = vmul.f32 %v407_v17, %v23_v0  ;;  %v536_v27 = vmul.f32 %v408_v18, %v24_v1  ;;  %v412_v32 = vadd.f32 1.0, %v284_v25  ;;  %v413_v38 = vadd.f32 1.0, %v285_v29  ;;  %v1815_v54 = vld [vmem:[#allocation2 + $0x58] sm:$0xff]  ;;  %v1824_v61 = vld [vmem:[#allocation2 + $0x60] sm:$0xff]  ;;  %v1828_v1 = vld [vmem:[#allocation2 + $0x68] sm:$0xff]  ;;  %p1738_p12 = pnand %p1737_p11, %p1731_p8 }
  0x1b   :  { %v537_v30 = vmul.f32 %v409_v23, %v25_v2  ;;  %v538_v31 = vmul.f32 %v410_v24, %v26_v5  ;;  %v539_v37 = vmul.f32 %v411_v28, %v27_v6  ;;  %v414_v48 = vadd.f32 1.0, %v286_v43  ;;  %v1836_v9 = vld [vmem:[#allocation2 + $0x70] sm:$0xff] }
  0x1c   :  { %v663_v35 = vmul.f32 0.7978846, %v535_v26  ;;  %v664_v36 = vmul.f32 0.7978846, %v536_v27  ;;  %v540_v42 = vmul.f32 %v412_v32, %v1785_v7  ;;  %v541_v46 = vmul.f32 %v413_v38, %v1787_v10 }
  0x1d   :  { %v665_v40 = vmul.f32 0.7978846, %v537_v30  ;;  %v666_v41 = vmul.f32 0.7978846, %v538_v31  ;;  %v667_v45 = vmul.f32 0.7978846, %v539_v37  ;;  %v159_v49 = vmul.f32 %v1799_v34, %v1799_v34 }
  0x1e   :  { %1452 = vtanh.f32 %v663_v35  ;;  %v668_v47 = vmul.f32 0.7978846, %v540_v42  ;;  %v669_v52 = vmul.f32 0.7978846, %v541_v46  ;;  %v160_v53 = vmul.f32 %v1801_v39, %v1801_v39 }
  0x1f   :  { %1454 = vtanh.f32 %v664_v36  ;;  %v1817_v55 = vmul.f32 0.5, %v26_v5  ;;  %v542_v56 = vmul.f32 %v414_v48, %v1793_v21  ;;  %v287_v57 = vmul.f32 0.044715, %v159_v49 }
  0x20   :  { %1456 = vtanh.f32 %v665_v40  ;;  %v1820_v58 = vmul.f32 0.5, %v27_v6  ;;  %v288_v59 = vmul.f32 0.044715, %v160_v53  ;;  %v161_v60 = vmul.f32 %v1809_v50, %v1809_v50  ;;  %v1855_v53 = vld [vmem:[#allocation2 + $0x80] sm:$0xff] }
  0x21   :  { %1458 = vtanh.f32 %v666_v41  ;;  %v670_v62 = vmul.f32 0.7978846, %v542_v56  ;;  %v415_v63 = vadd.f32 1.0, %v287_v57  ;;  %v162_v0 = vmul.f32 %v1815_v54, %v1815_v54 }
  0x22   :  { %1460 = vtanh.f32 %v667_v45  ;;  %v1831_v2 = vmul.f32 0.5, %v1785_v7  ;;  %v416_v3 = vadd.f32 1.0, %v288_v59  ;;  %v289_v4 = vmul.f32 0.044715, %v161_v60  ;;  %v1859_v60 = vld [vmem:[#allocation2 + $0x88] sm:$0xff] }
  0x23   :  { %1462 = vtanh.f32 %v668_v47  ;;  %v543_v5 = vmul.f32 %v415_v63, %v1799_v34  ;;  %v290_v6 = vmul.f32 0.044715, %v162_v0  ;;  %v163_v8 = vmul.f32 %v1824_v61, %v1824_v61  ;;  %v1852_v47 = vld [vmem:[#allocation2 + $0x78] sm:$0xff]  ;;  %v1862_v0 = vld [vmem:[#allocation2 + $0x90] sm:$0xff] }
  0x24   :  { %1464 = vtanh.f32 %v669_v52  ;;  %v797_v11 = vmul.f32 0.5, %v1787_v10  ;;  %v544_v12 = vmul.f32 %v416_v3, %v1801_v39  ;;  %v417_v13 = vadd.f32 1.0, %v289_v4 }
  0x25   :  { %1466 = vtanh.f32 %v670_v62  ;;  %v164_v7 = vmul.f32 %v1828_v1, %v1828_v1  ;;  %v798_v14 = vmul.f32 0.5, %v1793_v21  ;;  %v671_v15 = vmul.f32 0.7978846, %v543_v5 }
  0x26   :  { %v418_v16 = vadd.f32 1.0, %v290_v6  ;;  %v291_v17 = vmul.f32 0.044715, %v163_v8  ;;  %v672_v19 = vmul.f32 0.7978846, %v544_v12  ;;  %v545_v20 = vmul.f32 %v417_v13, %v1809_v50 }
  0x27   :  { %v292_v23 = vmul.f32 0.044715, %v164_v7  ;;  %v165_v24 = vmul.f32 %v1836_v9, %v1836_v9  ;;  %1468 = vtanh.f32 %v671_v15  ;;  %v800_v4 = vmul.f32 0.5, %v1801_v39  ;;  %v1876_v15 = vld [vmem:[#allocation2 + $0x98] sm:$0xff] }
  0x28   :  { %v1453_v18 = vpop.eup %1452  ;;  %v546_v26 = vmul.f32 %v418_v16, %v1815_v54  ;;  %v419_v27 = vadd.f32 1.0, %v291_v17  ;;  %1470 = vtanh.f32 %v672_v19  ;;  %v673_v21 = vmul.f32 0.7978846, %v545_v20 }
  0x29   :  { %v1455_v10 = vpop.eup %1454  ;;  %v1047_v25 = vadd.f32 1.0, %v1453_v18  ;;  %v420_v30 = vadd.f32 1.0, %v292_v23  ;;  %v801_v6 = vmul.f32 0.5, %v1809_v50  ;;  %v168_v8 = vmul.f32 %v1859_v60, %v1859_v60 }
  0x2a   :  { %v1457_v28 = vpop.eup %1456  ;;  %v1048_v29 = vadd.f32 1.0, %v1455_v10  ;;  %v674_v35 = vmul.f32 0.7978846, %v546_v26  ;;  %v547_v36 = vmul.f32 %v419_v27, %v1824_v61  ;;  %1472 = vtanh.f32 %v673_v21 }
  0x2b   :  { %v1459_v31 = vpop.eup %1458  ;;  %v1175_v32 = vmul.f32 %v1047_v25, %v1795_v22  ;;  %v1049_v33 = vadd.f32 1.0, %v1457_v28  ;;  %v548_v41 = vmul.f32 %v420_v30, %v1828_v1  ;;  %v169_v7 = vmul.f32 %v1862_v0, %v1862_v0 }
  0x2c   :  { %v1461_v37 = vpop.eup %1460  ;;  %v1176_v38 = vmul.f32 %v1048_v29, %v1804_v44  ;;  %v1050_v40 = vadd.f32 1.0, %v1459_v31  ;;  %1474 = vtanh.f32 %v674_v35  ;;  %v675_v46 = vmul.f32 0.7978846, %v547_v36  ;;  %v1884_v35 = vld [vmem:[#allocation2 + $0xa0] sm:$0xff] }
  0x2d   :  { %v1463_v42 = vpop.eup %1462  ;;  %1303 = vst [vmem:[#allocation5] sm:$0xff] %v1175_v32  ;;  %v1177_v43 = vmul.f32 %v1049_v33, %v1811_v51  ;;  %v1051_v45 = vadd.f32 1.0, %v1461_v37  ;;  %v676_v52 = vmul.f32 0.7978846, %v548_v41  ;;  %v293_v44 = vmul.f32 0.044715, %v165_v24 }
  0x2e   :  { %v1465_v22 = vpop.eup %1464  ;;  %1304 = vst [vmem:[#allocation5 + $0x8] sm:$0xff] %v1176_v38  ;;  %v1178_v48 = vmul.f32 %v1050_v40, %v1817_v55  ;;  %v1052_v49 = vadd.f32 1.0, %v1463_v42  ;;  %v799_v51 = vmul.f32 0.5, %v1799_v34  ;;  %1476 = vtanh.f32 %v675_v46 }
  0x2f   :  { %v1467_v56 = vpop.eup %1466  ;;  %1305 = vst [vmem:[#allocation5 + $0x10] sm:$0xff] %v1177_v43  ;;  %v1179_v57 = vmul.f32 %v1051_v45, %v1820_v58  ;;  %v1053_v59 = vadd.f32 1.0, %v1465_v22  ;;  %1478 = vtanh.f32 %v676_v52  ;;  %v421_v55 = vadd.f32 1.0, %v293_v44  ;;  %v1890_v44 = vld [vmem:[#allocation2 + $0xa8] sm:$0xff] }
  0x30   :  { %1306 = vst [vmem:[#allocation5 + $0x18] sm:$0xff] %v1178_v48  ;;  %v1180_v62 = vmul.f32 %v1052_v49, %v1831_v2  ;;  %v1054_v63 = vadd.f32 1.0, %v1467_v56  ;;  %v166_v58 = vmul.f32 %v1852_v47, %v1852_v47  ;;  %v167_v34 = vmul.f32 %v1855_v53, %v1855_v53  ;;  %v1892_v56 = vld [vmem:[#allocation2 + $0xb0] sm:$0xff] }
  0x31   :  { %1307 = vst [vmem:[#allocation5 + $0x20] sm:$0xff] %v1179_v57  ;;  %v1181_v3 = vmul.f32 %v1053_v59, %v797_v11  ;;  %v549_v2 = vmul.f32 %v421_v55, %v1836_v9  ;;  %v1469_v12 = vpop.eup %1468  ;;  %v802_v11 = vmul.f32 0.5, %v1815_v54  ;;  %v803_v50 = vmul.f32 0.5, %v1824_v61 }
  0x32   :  { %1308 = vst [vmem:[#allocation5 + $0x28] sm:$0xff] %v1180_v62  ;;  %v1182_v5 = vmul.f32 %v1054_v63, %v798_v14  ;;  %v294_v39 = vmul.f32 0.044715, %v166_v58  ;;  %v295_v13 = vmul.f32 0.044715, %v167_v34  ;;  %v1471_v16 = vpop.eup %1470  ;;  %v1055_v14 = vadd.f32 1.0, %v1469_v12 }
  0x33   :  { %1309 = vst [vmem:[#allocation5 + $0x30] sm:$0xff] %v1181_v3  ;;  %v677_v17 = vmul.f32 0.7978846, %v549_v2  ;;  %v296_v18 = vmul.f32 0.044715, %v168_v8  ;;  %v1056_v19 = vadd.f32 1.0, %v1471_v16  ;;  %v170_v26 = vmul.f32 %v1876_v15, %v1876_v15 }
  0x34   :  { %1310 = vst [vmem:[#allocation5 + $0x38] sm:$0xff] %v1182_v5  ;;  %v422_v20 = vadd.f32 1.0, %v294_v39  ;;  %v423_v23 = vadd.f32 1.0, %v295_v13  ;;  %v297_v24 = vmul.f32 0.044715, %v169_v7  ;;  %v1473_v10 = vpop.eup %1472  ;;  %v1183_v54 = vmul.f32 %v1055_v14, %v799_v51  ;;  %v1895_v51 = vld [vmem:[#allocation2 + $0xb8] sm:$0xff] }
  0x35   :  { %1480 = vtanh.f32 %v677_v17  ;;  %v424_v25 = vadd.f32 1.0, %v296_v18  ;;  %v1184_v28 = vmul.f32 %v1056_v19, %v800_v4  ;;  %v1057_v29 = vadd.f32 1.0, %v1473_v10  ;;  %v1898_v3 = vld [vmem:[#allocation2 + $0xc0] sm:$0xff]  ;;  %v1911_v13 = vld [vmem:[#allocation2 + $0xc8] sm:$0xff]  ;;  %v1915_v19 = vld [vmem:[#allocation2 + $0xd0] sm:$0xff] }
  0x36   :  { %v1475_v27 = vpop.eup %1474  ;;  %v550_v21 = vmul.f32 %v422_v20, %v1852_v47  ;;  %v551_v61 = vmul.f32 %v423_v23, %v1855_v53  ;;  %1311 = vst [vmem:[#allocation5 + $0x40] sm:$0xff] %v1183_v54  ;;  %v425_v32 = vadd.f32 1.0, %v297_v24  ;;  %v298_v33 = vmul.f32 0.044715, %v170_v26 }
  0x37   :  { %v1058_v30 = vadd.f32 1.0, %v1475_v27  ;;  %v552_v31 = vmul.f32 %v424_v25, %v1859_v60  ;;  %1312 = vst [vmem:[#allocation5 + $0x48] sm:$0xff] %v1184_v28  ;;  %v1185_v37 = vmul.f32 %v1057_v29, %v801_v6  ;;  %v804_v38 = vmul.f32 0.5, %v1828_v1 }
  0x38   :  { %v1477_v36 = vpop.eup %1476  ;;  %v678_v40 = vmul.f32 0.7978846, %v550_v21  ;;  %v679_v41 = vmul.f32 0.7978846, %v551_v61  ;;  %v553_v22 = vmul.f32 %v425_v32, %v1862_v0  ;;  %v426_v49 = vadd.f32 1.0, %v298_v33 }
  0x39   :  { %v1479_v42 = vpop.eup %1478  ;;  %v1186_v43 = vmul.f32 %v1058_v30, %v802_v11  ;;  %v1059_v45 = vadd.f32 1.0, %v1477_v36  ;;  %v680_v46 = vmul.f32 0.7978846, %v552_v31  ;;  %1313 = vst [vmem:[#allocation5 + $0x50] sm:$0xff] %v1185_v37  ;;  %v171_v52 = vmul.f32 %v1884_v35, %v1884_v35 }
  0x3a   :  { %v1060_v48 = vadd.f32 1.0, %v1479_v42  ;;  %1482 = vtanh.f32 %v678_v40  ;;  %v805_v57 = vmul.f32 0.5, %v1836_v9  ;;  %v681_v59 = vmul.f32 0.7978846, %v553_v22 }
  0x3b   :  { %1314 = vst [vmem:[#allocation5 + $0x58] sm:$0xff] %v1186_v43  ;;  %v1187_v1 = vmul.f32 %v1059_v45, %v803_v50  ;;  %1484 = vtanh.f32 %v679_v41  ;;  %v554_v63 = vmul.f32 %v426_v49, %v1876_v15  ;;  %v299_v55 = vmul.f32 0.044715, %v171_v52  ;;  %v1926_v45 = vld [vmem:[#allocation2 + $0xd8] sm:$0xff]  ;;  %v1929_v49 = vld [vmem:[#allocation2 + $0xe0] sm:$0xff] }
  0x3c   :  { %v1188_v62 = vmul.f32 %v1060_v48, %v804_v38  ;;  %1486 = vtanh.f32 %v680_v46  ;;  %v806_v4 = vmul.f32 0.5, %v1852_v47  ;;  %v172_v58 = vmul.f32 %v1890_v44, %v1890_v44 }
  0x3d   :  { %1315 = vst [vmem:[#allocation5 + $0x60] sm:$0xff] %v1187_v1  ;;  %1488 = vtanh.f32 %v681_v59  ;;  %v173_v9 = vmul.f32 %v1892_v56, %v1892_v56  ;;  %v807_v34 = vmul.f32 0.5, %v1855_v53  ;;  %v682_v5 = vmul.f32 0.7978846, %v554_v63  ;;  %v1932_v59 = vld [vmem:[#allocation2 + $0xe8] sm:$0xff] }
  0x3e   :  { %1316 = vst [vmem:[#allocation5 + $0x68] sm:$0xff] %v1188_v62  ;;  %v427_v6 = vadd.f32 1.0, %v299_v55  ;;  %v174_v2 = vmul.f32 %v1895_v51, %v1895_v51  ;;  %v808_v12 = vmul.f32 0.5, %v1859_v60  ;;  %v300_v11 = vmul.f32 0.044715, %v172_v58 }
  0x3f   :  { %v1481_v8 = vpop.eup %1480  ;;  %v301_v47 = vmul.f32 0.044715, %v173_v9  ;;  %v175_v39 = vmul.f32 %v1898_v3, %v1898_v3  ;;  %1490 = vtanh.f32 %v682_v5  ;;  %v809_v14 = vmul.f32 0.5, %v1862_v0  ;;  %v1940_v5 = vld [vmem:[#allocation2 + $0xf0] sm:$0xff] }
  0x40   :  { %v1061_v7 = vadd.f32 1.0, %v1481_v8  ;;  %v555_v16 = vmul.f32 %v427_v6, %v1884_v35  ;;  %v302_v53 = vmul.f32 0.044715, %v174_v2  ;;  %v428_v50 = vadd.f32 1.0, %v300_v11 }
  0x41   :  { %v429_v17 = vadd.f32 1.0, %v301_v47  ;;  %v303_v18 = vmul.f32 0.044715, %v175_v39  ;;  %v176_v24 = vmul.f32 %v1911_v13, %v1911_v13  ;;  %v810_v10 = vmul.f32 0.5, %v1876_v15 }
  0x42   :  { %v1189_v60 = vmul.f32 %v1061_v7, %v805_v57  ;;  %v683_v20 = vmul.f32 0.7978846, %v555_v16  ;;  %v430_v23 = vadd.f32 1.0, %v302_v53  ;;  %v556_v54 = vmul.f32 %v428_v50, %v1890_v44  ;;  %v1951_v50 = vld [vmem:[#allocation2 + $0x100] sm:$0xff] }
  0x43   :  { %v557_v25 = vmul.f32 %v429_v17, %v1892_v56  ;;  %v431_v26 = vadd.f32 1.0, %v303_v18  ;;  %v304_v28 = vmul.f32 0.044715, %v176_v24  ;;  %v177_v29 = vmul.f32 %v1915_v19, %v1915_v19 }
  0x44   :  { %v1483_v27 = vpop.eup %1482  ;;  %1317 = vst [vmem:[#allocation5 + $0x70] sm:$0xff] %v1189_v60  ;;  %1492 = vtanh.f32 %v683_v20  ;;  %v558_v0 = vmul.f32 %v430_v23, %v1895_v51  ;;  %v684_v30 = vmul.f32 0.7978846, %v556_v54  ;;  %v811_v1 = vmul.f32 0.5, %v1884_v35 }
  0x45   :  { %v1485_v21 = vpop.eup %1484  ;;  %v1062_v61 = vadd.f32 1.0, %v1483_v27  ;;  %v685_v31 = vmul.f32 0.7978846, %v557_v25  ;;  %v559_v15 = vmul.f32 %v431_v26, %v1898_v3  ;;  %v432_v37 = vadd.f32 1.0, %v304_v28 }
  0x46   :  { %v1487_v32 = vpop.eup %1486  ;;  %v1063_v33 = vadd.f32 1.0, %v1485_v21  ;;  %v686_v36 = vmul.f32 0.7978846, %v558_v0  ;;  %v305_v38 = vmul.f32 0.044715, %v177_v29  ;;  %1494 = vtanh.f32 %v684_v30 }
  0x47   :  { %v1489_v40 = vpop.eup %1488  ;;  %v1190_v41 = vmul.f32 %v1062_v61, %v806_v4  ;;  %v1064_v42 = vadd.f32 1.0, %v1487_v32  ;;  %v687_v43 = vmul.f32 0.7978846, %v559_v15  ;;  %1496 = vtanh.f32 %v685_v31 }
  0x48   :  { %v1191_v46 = vmul.f32 %v1063_v33, %v807_v34  ;;  %v1065_v22 = vadd.f32 1.0, %v1489_v40  ;;  %v560_v48 = vmul.f32 %v432_v37, %v1911_v13  ;;  %1498 = vtanh.f32 %v686_v36 }
  0x49   :  { %1318 = vst [vmem:[#allocation5 + $0x78] sm:$0xff] %v1190_v41  ;;  %v1192_v52 = vmul.f32 %v1064_v42, %v808_v12  ;;  %v433_v57 = vadd.f32 1.0, %v305_v38  ;;  %v1491_v62 = vpop.eup %1490  ;;  %1500 = vtanh.f32 %v687_v43  ;;  %v178_v4 = vmul.f32 %v1926_v45, %v1926_v45  ;;  %v1945_v12 = vld [vmem:[#allocation2 + $0xf8] sm:$0xff]  ;;  %v1962_v42 = vld [vmem:[#allocation2 + $0x108] sm:$0xff] }
  0x4a   :  { %1319 = vst [vmem:[#allocation5 + $0x80] sm:$0xff] %v1191_v46  ;;  %v1193_v63 = vmul.f32 %v1065_v22, %v809_v14  ;;  %v688_v55 = vmul.f32 0.7978846, %v560_v48  ;;  %v1066_v58 = vadd.f32 1.0, %v1491_v62  ;;  %v812_v9 = vmul.f32 0.5, %v1890_v44 }
  0x4b   :  { %1320 = vst [vmem:[#allocation5 + $0x88] sm:$0xff] %v1192_v52  ;;  %v561_v34 = vmul.f32 %v433_v57, %v1915_v19  ;;  %v179_v35 = vmul.f32 %v1929_v49, %v1929_v49  ;;  %v813_v6 = vmul.f32 0.5, %v1892_v56  ;;  %v306_v2 = vmul.f32 0.044715, %v178_v4  ;;  %v1965_v52 = vld [vmem:[#allocation2 + $0x110] sm:$0xff] }
  0x4c   :  { %1321 = vst [vmem:[#allocation5 + $0x90] sm:$0xff] %v1193_v63  ;;  %1502 = vtanh.f32 %v688_v55  ;;  %v180_v8 = vmul.f32 %v1932_v59, %v1932_v59  ;;  %v1194_v11 = vmul.f32 %v1066_v58, %v810_v10  ;;  %v814_v44 = vmul.f32 0.5, %v1895_v51 }
  0x4d   :  { %v689_v47 = vmul.f32 0.7978846, %v561_v34  ;;  %v307_v39 = vmul.f32 0.044715, %v179_v35  ;;  %v815_v16 = vmul.f32 0.5, %v1898_v3  ;;  %v434_v53 = vadd.f32 1.0, %v306_v2 }
  0x4e   :  { %v1493_v7 = vpop.eup %1492  ;;  %v308_v14 = vmul.f32 0.044715, %v180_v8  ;;  %v181_v56 = vmul.f32 %v1940_v5, %v1940_v5  ;;  %1322 = vst [vmem:[#allocation5 + $0x98] sm:$0xff] %v1194_v11  ;;  %v182_v60 = vmul.f32 %v1945_v12, %v1945_v12  ;;  %v816_v51 = vmul.f32 0.5, %v1911_v13  ;;  %v1972_v34 = vld [vmem:[#allocation2 + $0x118] sm:$0xff]  ;;  %v1974_v35 = vld [vmem:[#allocation2 + $0x120] sm:$0xff] }
  0x4f   :  { %v1067_v17 = vadd.f32 1.0, %v1493_v7  ;;  %1504 = vtanh.f32 %v689_v47  ;;  %v435_v18 = vadd.f32 1.0, %v307_v39  ;;  %v562_v20 = vmul.f32 %v434_v53, %v1926_v45  ;;  %v1979_v47 = vld [vmem:[#allocation2 + $0x128] sm:$0xff]  ;;  %v1986_v53 = vld [vmem:[#allocation2 + $0x130] sm:$0xff] }
  0x50   :  { %v436_v23 = vadd.f32 1.0, %v308_v14  ;;  %v309_v3 = vmul.f32 0.044715, %v181_v56  ;;  %v1495_v24 = vpop.eup %1494  ;;  %v310_v25 = vmul.f32 0.044715, %v182_v60  ;;  %v183_v26 = vmul.f32 %v1951_v50, %v1951_v50 }
  0x51   :  { %v1195_v10 = vmul.f32 %v1067_v17, %v811_v1  ;;  %v563_v54 = vmul.f32 %v435_v18, %v1929_v49  ;;  %v1497_v27 = vpop.eup %1496  ;;  %v1068_v0 = vadd.f32 1.0, %v1495_v24  ;;  %v690_v28 = vmul.f32 0.7978846, %v562_v20  ;;  %v1991_v20 = vld [vmem:[#allocation2 + $0x138] sm:$0xff] }
  0x52   :  { %v564_v29 = vmul.f32 %v436_v23, %v1932_v59  ;;  %v437_v21 = vadd.f32 1.0, %v309_v3  ;;  %v1499_v61 = vpop.eup %1498  ;;  %v1069_v13 = vadd.f32 1.0, %v1497_v27  ;;  %v438_v31 = vadd.f32 1.0, %v310_v25 }
  0x53   :  { %1323 = vst [vmem:[#allocation5 + $0xa0] sm:$0xff] %v1195_v10  ;;  %v691_v30 = vmul.f32 0.7978846, %v563_v54  ;;  %v311_v15 = vmul.f32 0.044715, %v183_v26  ;;  %v1501_v32 = vpop.eup %1500  ;;  %v1196_v33 = vmul.f32 %v1068_v0, %v812_v9  ;;  %v1070_v36 = vadd.f32 1.0, %v1499_v61 }
  0x54   :  { %1506 = vtanh.f32 %v690_v28  ;;  %v692_v37 = vmul.f32 0.7978846, %v564_v29  ;;  %v1197_v38 = vmul.f32 %v1069_v13, %v813_v6  ;;  %v1071_v40 = vadd.f32 1.0, %v1501_v32 }
  0x55   :  { %1508 = vtanh.f32 %v691_v30  ;;  %v565_v41 = vmul.f32 %v437_v21, %v1940_v5  ;;  %1324 = vst [vmem:[#allocation5 + $0xa8] sm:$0xff] %v1196_v33  ;;  %v1198_v46 = vmul.f32 %v1070_v36, %v814_v44  ;;  %v566_v22 = vmul.f32 %v438_v31, %v1945_v12 }
  0x56   :  { %v1503_v43 = vpop.eup %1502  ;;  %1510 = vtanh.f32 %v692_v37  ;;  %v439_v48 = vadd.f32 1.0, %v311_v15  ;;  %1325 = vst [vmem:[#allocation5 + $0xb0] sm:$0xff] %v1197_v38  ;;  %v1199_v1 = vmul.f32 %v1071_v40, %v815_v16  ;;  %v817_v62 = vmul.f32 0.5, %v1915_v19 }
  0x57   :  { %v1072_v57 = vadd.f32 1.0, %v1503_v43  ;;  %v693_v63 = vmul.f32 0.7978846, %v565_v41  ;;  %1326 = vst [vmem:[#allocation5 + $0xb8] sm:$0xff] %v1198_v46  ;;  %v818_v55 = vmul.f32 0.5, %v1926_v45  ;;  %v184_v9 = vmul.f32 %v1962_v42, %v1962_v42 }
  0x58   :  { %v694_v4 = vmul.f32 0.7978846, %v566_v22  ;;  %v567_v58 = vmul.f32 %v439_v48, %v1951_v50  ;;  %1327 = vst [vmem:[#allocation5 + $0xc0] sm:$0xff] %v1199_v1  ;;  %v819_v8 = vmul.f32 0.5, %v1929_v49  ;;  %v185_v19 = vmul.f32 %v1965_v52, %v1965_v52  ;;  %v2004_v1 = vld [vmem:[#allocation2 + $0x140] sm:$0xff] }
  0x59   :  { %v1505_v6 = vpop.eup %1504  ;;  %v1200_v2 = vmul.f32 %v1072_v57, %v816_v51  ;;  %1512 = vtanh.f32 %v693_v63  ;;  %v312_v44 = vmul.f32 0.044715, %v184_v9  ;;  %v820_v39 = vmul.f32 0.5, %v1932_v59 }
  0x5a   :  { %v1073_v45 = vadd.f32 1.0, %v1505_v6  ;;  %1514 = vtanh.f32 %v694_v4  ;;  %v695_v11 = vmul.f32 0.7978846, %v567_v58  ;;  %v313_v7 = vmul.f32 0.044715, %v185_v19 }
  0x5b   :  { %1328 = vst [vmem:[#allocation5 + $0xc8] sm:$0xff] %v1200_v2  ;;  %v186_v16 = vmul.f32 %v1972_v34, %v1972_v34  ;;  %v187_v49 = vmul.f32 %v1974_v35, %v1974_v35  ;;  %v821_v56 = vmul.f32 0.5, %v1940_v5  ;;  %v440_v17 = vadd.f32 1.0, %v312_v44 }
  0x5c   :  { %v1201_v14 = vmul.f32 %v1073_v45, %v817_v62  ;;  %1516 = vtanh.f32 %v695_v11  ;;  %v441_v18 = vadd.f32 1.0, %v313_v7  ;;  %v188_v59 = vmul.f32 %v1979_v47, %v1979_v47  ;;  %v2012_v11 = vld [vmem:[#allocation2 + $0x150] sm:$0xff]  ;;  %v2018_v7 = vld [vmem:[#allocation2 + $0x158] sm:$0xff] }
  0x5d   :  { %v314_v60 = vmul.f32 0.044715, %v186_v16  ;;  %v315_v51 = vmul.f32 0.044715, %v187_v49  ;;  %v822_v3 = vmul.f32 0.5, %v1945_v12  ;;  %v823_v24 = vmul.f32 0.5, %v1951_v50 }
  0x5e   :  { %v1507_v23 = vpop.eup %1506  ;;  %1329 = vst [vmem:[#allocation5 + $0xd0] sm:$0xff] %v1201_v14  ;;  %v568_v10 = vmul.f32 %v440_v17, %v1962_v42  ;;  %v189_v5 = vmul.f32 %v1986_v53, %v1986_v53  ;;  %v569_v26 = vmul.f32 %v441_v18, %v1965_v52  ;;  %v316_v61 = vmul.f32 0.044715, %v188_v59  ;;  %v2021_v17 = vld [vmem:[#allocation2 + $0x160] sm:$0xff] }
  0x5f   :  { %v1509_v54 = vpop.eup %1508  ;;  %v1074_v25 = vadd.f32 1.0, %v1507_v23  ;;  %v442_v27 = vadd.f32 1.0, %v314_v60  ;;  %v443_v0 = vadd.f32 1.0, %v315_v51  ;;  %v190_v12 = vmul.f32 %v1991_v20, %v1991_v20 }
  0x60   :  { %v1511_v28 = vpop.eup %1510  ;;  %v1075_v29 = vadd.f32 1.0, %v1509_v54  ;;  %v696_v21 = vmul.f32 0.7978846, %v568_v10  ;;  %v697_v30 = vmul.f32 0.7978846, %v569_v26  ;;  %v444_v33 = vadd.f32 1.0, %v316_v61 }
  0x61   :  { %v1202_v13 = vmul.f32 %v1074_v25, %v818_v55  ;;  %v1076_v50 = vadd.f32 1.0, %v1511_v28  ;;  %v570_v31 = vmul.f32 %v442_v27, %v1972_v34  ;;  %v571_v32 = vmul.f32 %v443_v0, %v1974_v35  ;;  %v2007_v55 = vld [vmem:[#allocation2 + $0x148] sm:$0xff] }
  0x62   :  { %v1203_v15 = vmul.f32 %v1075_v29, %v819_v8  ;;  %1518 = vtanh.f32 %v696_v21  ;;  %v317_v40 = vmul.f32 0.044715, %v189_v5  ;;  %v572_v22 = vmul.f32 %v444_v33, %v1979_v47  ;;  %v2031_v5 = vld [vmem:[#allocation2 + $0x168] sm:$0xff] }
  0x63   :  { %v1513_v36 = vpop.eup %1512  ;;  %1330 = vst [vmem:[#allocation5 + $0xd8] sm:$0xff] %v1202_v13  ;;  %v1204_v37 = vmul.f32 %v1076_v50, %v820_v39  ;;  %1520 = vtanh.f32 %v697_v30  ;;  %v698_v38 = vmul.f32 0.7978846, %v570_v31  ;;  %v699_v46 = vmul.f32 0.7978846, %v571_v32 }
  0x64   :  { %v1515_v41 = vpop.eup %1514  ;;  %1331 = vst [vmem:[#allocation5 + $0xe0] sm:$0xff] %v1203_v15  ;;  %v1077_v43 = vadd.f32 1.0, %v1513_v36  ;;  %v318_v48 = vmul.f32 0.044715, %v190_v12  ;;  %v824_v62 = vmul.f32 0.5, %v1962_v42  ;;  %v445_v63 = vadd.f32 1.0, %v317_v40 }
  0x65   :  { %1332 = vst [vmem:[#allocation5 + $0xe8] sm:$0xff] %v1204_v37  ;;  %v1078_v57 = vadd.f32 1.0, %v1515_v41  ;;  %1522 = vtanh.f32 %v698_v38  ;;  %v700_v9 = vmul.f32 0.7978846, %v572_v22  ;;  %v191_v45 = vmul.f32 %v2004_v1, %v2004_v1  ;;  %v2040_v40 = vld [vmem:[#allocation2 + $0x170] sm:$0xff] }
  0x66   :  { %v1517_v4 = vpop.eup %1516  ;;  %v1205_v58 = vmul.f32 %v1077_v43, %v821_v56  ;;  %1524 = vtanh.f32 %v699_v46  ;;  %v446_v6 = vadd.f32 1.0, %v318_v48  ;;  %v573_v19 = vmul.f32 %v445_v63, %v1986_v53 }
  0x67   :  { %v1206_v2 = vmul.f32 %v1078_v57, %v822_v3  ;;  %v1079_v8 = vadd.f32 1.0, %v1517_v4  ;;  %v825_v42 = vmul.f32 0.5, %v1965_v52  ;;  %1526 = vtanh.f32 %v700_v9  ;;  %v2043_v4 = vld [vmem:[#allocation2 + $0x178] sm:$0xff] }
  0x68   :  { %1333 = vst [vmem:[#allocation5 + $0xf0] sm:$0xff] %v1205_v58  ;;  %v574_v44 = vmul.f32 %v446_v6, %v1991_v20  ;;  %v192_v39 = vmul.f32 %v2007_v55, %v2007_v55  ;;  %v826_v49 = vmul.f32 0.5, %v1972_v34  ;;  %v701_v14 = vmul.f32 0.7978846, %v573_v19 }
  0x69   :  { %1334 = vst [vmem:[#allocation5 + $0xf8] sm:$0xff] %v1206_v2  ;;  %v1207_v16 = vmul.f32 %v1079_v8, %v823_v24  ;;  %v319_v56 = vmul.f32 0.044715, %v191_v45  ;;  %v827_v18 = vmul.f32 0.5, %v1974_v35  ;;  %v193_v51 = vmul.f32 %v2012_v11, %v2012_v11  ;;  %v2048_v2 = vld [vmem:[#allocation2 + $0x180] sm:$0xff] }
  0x6a   :  { %v702_v60 = vmul.f32 0.7978846, %v574_v44  ;;  %v320_v52 = vmul.f32 0.044715, %v192_v39  ;;  %v828_v59 = vmul.f32 0.5, %v1979_v47  ;;  %1528 = vtanh.f32 %v701_v14  ;;  %v2054_v14 = vld [vmem:[#allocation2 + $0x188] sm:$0xff] }
  0x6b   :  { %1335 = vst [vmem:[#allocation5 + $0x100] sm:$0xff] %v1207_v16  ;;  %v447_v23 = vadd.f32 1.0, %v319_v56  ;;  %v194_v3 = vmul.f32 %v2018_v7, %v2018_v7  ;;  %v321_v10 = vmul.f32 0.044715, %v193_v51  ;;  %v195_v35 = vmul.f32 %v2021_v17, %v2021_v17 }
  0x6c   :  { %v1519_v34 = vpop.eup %1518  ;;  %1530 = vtanh.f32 %v702_v60  ;;  %v448_v24 = vadd.f32 1.0, %v320_v52  ;;  %v829_v26 = vmul.f32 0.5, %v1986_v53  ;;  %v196_v30 = vmul.f32 %v2031_v5, %v2031_v5 }
  0x6d   :  { %v1521_v54 = vpop.eup %1520  ;;  %v1080_v25 = vadd.f32 1.0, %v1519_v34  ;;  %v575_v47 = vmul.f32 %v447_v23, %v2004_v1  ;;  %v322_v27 = vmul.f32 0.044715, %v194_v3  ;;  %v449_v29 = vadd.f32 1.0, %v321_v10  ;;  %v2059_v23 = vld [vmem:[#allocation2 + $0x190] sm:$0xff] }
  0x6e   :  { %v1081_v0 = vadd.f32 1.0, %v1521_v54  ;;  %v576_v28 = vmul.f32 %v448_v24, %v2007_v55  ;;  %v323_v21 = vmul.f32 0.044715, %v195_v35  ;;  %v324_v22 = vmul.f32 0.044715, %v196_v30  ;;  %v2064_v35 = vld [vmem:[#allocation2 + $0x198] sm:$0xff] }
  0x6f   :  { %v1523_v61 = vpop.eup %1522  ;;  %v1208_v12 = vmul.f32 %v1080_v25, %v824_v62  ;;  %v703_v13 = vmul.f32 0.7978846, %v575_v47  ;;  %v450_v50 = vadd.f32 1.0, %v322_v27  ;;  %v577_v53 = vmul.f32 %v449_v29, %v2012_v11 }
  0x70   :  { %v1525_v31 = vpop.eup %1524  ;;  %v1209_v15 = vmul.f32 %v1081_v0, %v825_v42  ;;  %v1082_v32 = vadd.f32 1.0, %v1523_v61  ;;  %v704_v33 = vmul.f32 0.7978846, %v576_v28  ;;  %v451_v38 = vadd.f32 1.0, %v323_v21 }
  0x71   :  { %1336 = vst [vmem:[#allocation5 + $0x108] sm:$0xff] %v1208_v12  ;;  %v1083_v36 = vadd.f32 1.0, %v1525_v31  ;;  %1532 = vtanh.f32 %v703_v13  ;;  %v578_v37 = vmul.f32 %v450_v50, %v2018_v7  ;;  %v1527_v41 = vpop.eup %1526  ;;  %v705_v46 = vmul.f32 0.7978846, %v577_v53 }
  0x72   :  { %1337 = vst [vmem:[#allocation5 + $0x110] sm:$0xff] %v1209_v15  ;;  %v1210_v43 = vmul.f32 %v1082_v32, %v826_v49  ;;  %1534 = vtanh.f32 %v704_v33  ;;  %v1084_v57 = vadd.f32 1.0, %v1527_v41  ;;  %v579_v63 = vmul.f32 %v451_v38, %v2021_v17 }
  0x73   :  { %v1211_v48 = vmul.f32 %v1083_v36, %v827_v18  ;;  %v706_v62 = vmul.f32 0.7978846, %v578_v37  ;;  %v830_v58 = vmul.f32 0.5, %v1991_v20  ;;  %1536 = vtanh.f32 %v705_v46 }
  0x74   :  { %1338 = vst [vmem:[#allocation5 + $0x118] sm:$0xff] %v1210_v43  ;;  %v452_v9 = vadd.f32 1.0, %v324_v22  ;;  %v197_v6 = vmul.f32 %v2040_v40, %v2040_v40  ;;  %v1529_v8 = vpop.eup %1528  ;;  %v1212_v19 = vmul.f32 %v1084_v57, %v828_v59  ;;  %v831_v45 = vmul.f32 0.5, %v2004_v1  ;;  %v2076_v22 = vld [vmem:[#allocation2 + $0x1a0] sm:$0xff] }
  0x75   :  { %1339 = vst [vmem:[#allocation5 + $0x120] sm:$0xff] %v1211_v48  ;;  %1538 = vtanh.f32 %v706_v62  ;;  %v707_v42 = vmul.f32 0.7978846, %v579_v63  ;;  %v1085_v39 = vadd.f32 1.0, %v1529_v8  ;;  %v198_v20 = vmul.f32 %v2043_v4, %v2043_v4  ;;  %v2078_v48 = vld [vmem:[#allocation2 + $0x1a8] sm:$0xff] }
  0x76   :  { %v1531_v44 = vpop.eup %1530  ;;  %v580_v16 = vmul.f32 %v452_v9, %v2031_v5  ;;  %v325_v49 = vmul.f32 0.044715, %v197_v6  ;;  %1340 = vst [vmem:[#allocation5 + $0x128] sm:$0xff] %v1212_v19  ;;  %v832_v18 = vmul.f32 0.5, %v2007_v55  ;;  %v199_v1 = vmul.f32 %v2048_v2, %v2048_v2 }
  0x77   :  { %v1086_v56 = vadd.f32 1.0, %v1531_v44  ;;  %1540 = vtanh.f32 %v707_v42  ;;  %v1213_v60 = vmul.f32 %v1085_v39, %v829_v26  ;;  %v326_v59 = vmul.f32 0.044715, %v198_v20  ;;  %v2090_v39 = vld [vmem:[#allocation2 + $0x1b8] sm:$0xff] }
  0x78   :  { %v708_v52 = vmul.f32 0.7978846, %v580_v16  ;;  %v453_v51 = vadd.f32 1.0, %v325_v49  ;;  %v833_v34 = vmul.f32 0.5, %v2012_v11  ;;  %v327_v24 = vmul.f32 0.044715, %v199_v1 }
  0x79   :  { %v1214_v3 = vmul.f32 %v1086_v56, %v830_v58  ;;  %v200_v10 = vmul.f32 %v2054_v14, %v2054_v14  ;;  %1341 = vst [vmem:[#allocation5 + $0x130] sm:$0xff] %v1213_v60  ;;  %v834_v55 = vmul.f32 0.5, %v2018_v7  ;;  %v454_v25 = vadd.f32 1.0, %v326_v59 }
  0x7a   :  { %1542 = vtanh.f32 %v708_v52  ;;  %v581_v54 = vmul.f32 %v453_v51, %v2040_v40  ;;  %v835_v47 = vmul.f32 0.5, %v2021_v17  ;;  %v455_v27 = vadd.f32 1.0, %v327_v24  ;;  %v2095_v51 = vld [vmem:[#allocation2 + $0x1c0] sm:$0xff] }
  0x7b   :  { %v1533_v26 = vpop.eup %1532  ;;  %1342 = vst [vmem:[#allocation5 + $0x138] sm:$0xff] %v1214_v3  ;;  %v328_v0 = vmul.f32 0.044715, %v200_v10  ;;  %v201_v11 = vmul.f32 %v2059_v23, %v2059_v23  ;;  %v582_v61 = vmul.f32 %v454_v25, %v2043_v4  ;;  %v202_v7 = vmul.f32 %v2064_v35, %v2064_v35 }
  0x7c   :  { %v1535_v28 = vpop.eup %1534  ;;  %v1087_v29 = vadd.f32 1.0, %v1533_v26  ;;  %v709_v21 = vmul.f32 0.7978846, %v581_v54  ;;  %v583_v13 = vmul.f32 %v455_v27, %v2048_v2  ;;  %v836_v63 = vmul.f32 0.5, %v2031_v5 }
  0x7d   :  { %v1088_v12 = vadd.f32 1.0, %v1535_v28  ;;  %v456_v50 = vadd.f32 1.0, %v328_v0  ;;  %v329_v30 = vmul.f32 0.044715, %v201_v11  ;;  %v1537_v31 = vpop.eup %1536  ;;  %v710_v15 = vmul.f32 0.7978846, %v582_v61 }
  0x7e   :  { %v1215_v17 = vmul.f32 %v1087_v29, %v831_v45  ;;  %1544 = vtanh.f32 %v709_v21  ;;  %v330_v32 = vmul.f32 0.044715, %v202_v7  ;;  %v1089_v36 = vadd.f32 1.0, %v1537_v31  ;;  %v2083_v45 = vld [vmem:[#allocation2 + $0x1b0] sm:$0xff] }
  0x7f   :  { %v1539_v33 = vpop.eup %1538  ;;  %v1216_v53 = vmul.f32 %v1088_v12, %v832_v18  ;;  %v711_v37 = vmul.f32 0.7978846, %v583_v13  ;;  %v584_v38 = vmul.f32 %v456_v50, %v2054_v14  ;;  %1546 = vtanh.f32 %v710_v15  ;;  %v2111_v7 = vld [vmem:[#allocation2 + $0x1d0] sm:$0xff] }
  0x80   :  { %1343 = vst [vmem:[#allocation5 + $0x140] sm:$0xff] %v1215_v17  ;;  %v1090_v41 = vadd.f32 1.0, %v1539_v33  ;;  %v457_v43 = vadd.f32 1.0, %v329_v30  ;;  %v458_v46 = vadd.f32 1.0, %v330_v32  ;;  %v1217_v62 = vmul.f32 %v1089_v36, %v833_v34 }
  0x81   :  { %v1541_v57 = vpop.eup %1540  ;;  %1344 = vst [vmem:[#allocation5 + $0x148] sm:$0xff] %v1216_v53  ;;  %1548 = vtanh.f32 %v711_v37  ;;  %v712_v58 = vmul.f32 0.7978846, %v584_v38  ;;  %v837_v42 = vmul.f32 0.5, %v2040_v40  ;;  %v203_v44 = vmul.f32 %v2076_v22, %v2076_v22  ;;  %v2117_v38 = vld [vmem:[#allocation2 + $0x1d8] sm:$0xff] }
  0x82   :  { %v1218_v9 = vmul.f32 %v1090_v41, %v834_v55  ;;  %v1091_v6 = vadd.f32 1.0, %v1541_v57  ;;  %v585_v8 = vmul.f32 %v457_v43, %v2059_v23  ;;  %v586_v19 = vmul.f32 %v458_v46, %v2064_v35  ;;  %1345 = vst [vmem:[#allocation5 + $0x150] sm:$0xff] %v1217_v62 }
  0x83   :  { %1550 = vtanh.f32 %v712_v58  ;;  %v204_v5 = vmul.f32 %v2078_v48, %v2078_v48  ;;  %v838_v20 = vmul.f32 0.5, %v2043_v4  ;;  %v331_v60 = vmul.f32 0.044715, %v203_v44  ;;  %v2101_v4 = vld [vmem:[#allocation2 + $0x1c8] sm:$0xff] }
  0x84   :  { %v1543_v16 = vpop.eup %1542  ;;  %1346 = vst [vmem:[#allocation5 + $0x158] sm:$0xff] %v1218_v9  ;;  %v1219_v49 = vmul.f32 %v1091_v6, %v835_v47  ;;  %v713_v56 = vmul.f32 0.7978846, %v585_v8  ;;  %v714_v18 = vmul.f32 0.7978846, %v586_v19  ;;  %v205_v40 = vmul.f32 %v2083_v45, %v2083_v45 }
  0x85   :  { %v1092_v1 = vadd.f32 1.0, %v1543_v16  ;;  %v332_v52 = vmul.f32 0.044715, %v204_v5  ;;  %v839_v59 = vmul.f32 0.5, %v2048_v2  ;;  %v840_v3 = vmul.f32 0.5, %v2054_v14 }
  0x86   :  { %1347 = vst [vmem:[#allocation5 + $0x160] sm:$0xff] %v1219_v49  ;;  %1552 = vtanh.f32 %v713_v56  ;;  %v206_v34 = vmul.f32 %v2090_v39, %v2090_v39  ;;  %v459_v10 = vadd.f32 1.0, %v331_v60  ;;  %v841_v25 = vmul.f32 0.5, %v2059_v23  ;;  %v2127_v60 = vld [vmem:[#allocation2 + $0x1e8] sm:$0xff] }
  0x87   :  { %v1220_v24 = vmul.f32 %v1092_v1, %v836_v63  ;;  %1554 = vtanh.f32 %v714_v18  ;;  %v460_v55 = vadd.f32 1.0, %v332_v52  ;;  %v333_v26 = vmul.f32 0.044715, %v205_v40 }
  0x88   :  { %v1545_v54 = vpop.eup %1544  ;;  %v334_v47 = vmul.f32 0.044715, %v206_v34  ;;  %v207_v2 = vmul.f32 %v2095_v51, %v2095_v51  ;;  %v587_v27 = vmul.f32 %v459_v10, %v2076_v22  ;;  %v208_v11 = vmul.f32 %v2101_v4, %v2101_v4 }
  0x89   :  { %1348 = vst [vmem:[#allocation5 + $0x168] sm:$0xff] %v1220_v24  ;;  %v1093_v14 = vadd.f32 1.0, %v1545_v54  ;;  %v588_v0 = vmul.f32 %v460_v55, %v2078_v48  ;;  %v1547_v28 = vpop.eup %1546  ;;  %v842_v29 = vmul.f32 0.5, %v2064_v35  ;;  %v461_v21 = vadd.f32 1.0, %v333_v26  ;;  %v2135_v55 = vld [vmem:[#allocation2 + $0x1f8] sm:$0xff] }
  0x8a   :  { %v462_v61 = vadd.f32 1.0, %v334_v47  ;;  %v335_v23 = vmul.f32 0.044715, %v207_v2  ;;  %v1094_v50 = vadd.f32 1.0, %v1547_v28  ;;  %v715_v30 = vmul.f32 0.7978846, %v587_v27 }
  0x8b   :  { %v1549_v12 = vpop.eup %1548  ;;  %v1221_v13 = vmul.f32 %v1093_v14, %v837_v42  ;;  %v716_v31 = vmul.f32 0.7978846, %v588_v0  ;;  %v589_v15 = vmul.f32 %v461_v21, %v2083_v45  ;;  %v336_v35 = vmul.f32 0.044715, %v208_v11  ;;  %v2123_v42 = vld [vmem:[#allocation2 + $0x1e0] sm:$0xff] }
  0x8c   :  { %v1095_v17 = vadd.f32 1.0, %v1549_v12  ;;  %v590_v32 = vmul.f32 %v462_v61, %v2090_v39  ;;  %v463_v33 = vadd.f32 1.0, %v335_v23  ;;  %v1222_v36 = vmul.f32 %v1094_v50, %v838_v20  ;;  %v2147_v28 = vld [vmem:[#allocation2 + $0x200] sm:$0xff] }
  0x8d   :  { %v1551_v53 = vpop.eup %1550  ;;  %1349 = vst [vmem:[#allocation5 + $0x170] sm:$0xff] %v1221_v13  ;;  %1556 = vtanh.f32 %v715_v30  ;;  %v209_v37 = vmul.f32 %v2111_v7, %v2111_v7  ;;  %v717_v46 = vmul.f32 0.7978846, %v589_v15  ;;  %v464_v63 = vadd.f32 1.0, %v336_v35 }
  0x8e   :  { %v1223_v41 = vmul.f32 %v1095_v17, %v839_v59  ;;  %v1096_v43 = vadd.f32 1.0, %v1551_v53  ;;  %1558 = vtanh.f32 %v716_v31  ;;  %1350 = vst [vmem:[#allocation5 + $0x178] sm:$0xff] %v1222_v36  ;;  %v718_v57 = vmul.f32 0.7978846, %v590_v32  ;;  %v2131_v59 = vld [vmem:[#allocation2 + $0x1f0] sm:$0xff] }
  0x8f   :  { %v591_v62 = vmul.f32 %v463_v33, %v2095_v51  ;;  %v337_v58 = vmul.f32 0.044715, %v209_v37  ;;  %v843_v8 = vmul.f32 0.5, %v2076_v22  ;;  %1560 = vtanh.f32 %v717_v46  ;;  %v2154_v46 = vld [vmem:[#allocation2 + $0x208] sm:$0xff] }
  0x90   :  { %v1553_v9 = vpop.eup %1552  ;;  %1351 = vst [vmem:[#allocation5 + $0x180] sm:$0xff] %v1223_v41  ;;  %v1224_v6 = vmul.f32 %v1096_v43, %v840_v3  ;;  %v210_v19 = vmul.f32 %v2117_v38, %v2117_v38  ;;  %1562 = vtanh.f32 %v718_v57  ;;  %v592_v49 = vmul.f32 %v464_v63, %v2101_v4 }
  0x91   :  { %v1555_v44 = vpop.eup %1554  ;;  %v1097_v5 = vadd.f32 1.0, %v1553_v9  ;;  %v719_v16 = vmul.f32 0.7978846, %v591_v62  ;;  %v844_v56 = vmul.f32 0.5, %v2078_v48  ;;  %v465_v18 = vadd.f32 1.0, %v337_v58 }
  0x92   :  { %1352 = vst [vmem:[#allocation5 + $0x188] sm:$0xff] %v1224_v6  ;;  %v1098_v20 = vadd.f32 1.0, %v1555_v44  ;;  %v338_v1 = vmul.f32 0.044715, %v210_v19  ;;  %v720_v52 = vmul.f32 0.7978846, %v592_v49  ;;  %v211_v40 = vmul.f32 %v2123_v42, %v2123_v42 }
  0x93   :  { %v1225_v22 = vmul.f32 %v1097_v5, %v841_v25  ;;  %1564 = vtanh.f32 %v719_v16  ;;  %v845_v34 = vmul.f32 0.5, %v2083_v45  ;;  %v593_v24 = vmul.f32 %v465_v18, %v2111_v7  ;;  %v2158_v44 = vld [vmem:[#allocation2 + $0x210] sm:$0xff] }
  0x94   :  { %v1226_v3 = vmul.f32 %v1098_v20, %v842_v29  ;;  %v466_v10 = vadd.f32 1.0, %v338_v1  ;;  %v846_v48 = vmul.f32 0.5, %v2090_v39  ;;  %1566 = vtanh.f32 %v720_v52 }
  0x95   :  { %1353 = vst [vmem:[#allocation5 + $0x190] sm:$0xff] %v1225_v22  ;;  %v339_v54 = vmul.f32 0.044715, %v211_v40  ;;  %v212_v25 = vmul.f32 %v2127_v60, %v2127_v60  ;;  %v847_v26 = vmul.f32 0.5, %v2095_v51  ;;  %v721_v47 = vmul.f32 0.7978846, %v593_v24 }
  0x96   :  { %1354 = vst [vmem:[#allocation5 + $0x198] sm:$0xff] %v1226_v3  ;;  %v594_v2 = vmul.f32 %v466_v10, %v2117_v38  ;;  %v213_v45 = vmul.f32 %v2131_v59, %v2131_v59  ;;  %v848_v27 = vmul.f32 0.5, %v2101_v4  ;;  %v214_v39 = vmul.f32 %v2135_v55, %v2135_v55  ;;  %v2169_v3 = vld [vmem:[#allocation2 + $0x220] sm:$0xff] }
  0x97   :  { %v1557_v14 = vpop.eup %1556  ;;  %v467_v0 = vadd.f32 1.0, %v339_v54  ;;  %v340_v11 = vmul.f32 0.044715, %v212_v25  ;;  %1568 = vtanh.f32 %v721_v47  ;;  %v215_v17 = vmul.f32 %v2147_v28, %v2147_v28 }
  0x98   :  { %v1559_v29 = vpop.eup %1558  ;;  %v1099_v21 = vadd.f32 1.0, %v1557_v14  ;;  %v722_v51 = vmul.f32 0.7978846, %v594_v2  ;;  %v341_v61 = vmul.f32 0.044715, %v213_v45  ;;  %v849_v63 = vmul.f32 0.5, %v2111_v7 }
  0x99   :  { %v1100_v23 = vadd.f32 1.0, %v1559_v29  ;;  %v595_v12 = vmul.f32 %v467_v0, %v2123_v42  ;;  %v468_v13 = vadd.f32 1.0, %v340_v11  ;;  %v342_v50 = vmul.f32 0.044715, %v214_v39  ;;  %v1561_v30 = vpop.eup %1560 }
  0x9a   :  { %v1227_v31 = vmul.f32 %v1099_v21, %v843_v8  ;;  %1570 = vtanh.f32 %v722_v51  ;;  %v469_v4 = vadd.f32 1.0, %v341_v61  ;;  %v1563_v15 = vpop.eup %1562  ;;  %v1101_v33 = vadd.f32 1.0, %v1561_v30 }
  0x9b   :  { %v1228_v32 = vmul.f32 %v1100_v23, %v844_v56  ;;  %v723_v53 = vmul.f32 0.7978846, %v595_v12  ;;  %v596_v36 = vmul.f32 %v468_v13, %v2127_v60  ;;  %v1102_v35 = vadd.f32 1.0, %v1563_v15  ;;  %v2163_v56 = vld [vmem:[#allocation2 + $0x218] sm:$0xff] }
  0x9c   :  { %1355 = vst [vmem:[#allocation5 + $0x1a0] sm:$0xff] %v1227_v31  ;;  %v597_v37 = vmul.f32 %v469_v4, %v2131_v59  ;;  %v470_v41 = vadd.f32 1.0, %v342_v50  ;;  %v343_v43 = vmul.f32 0.044715, %v215_v17  ;;  %v1229_v62 = vmul.f32 %v1101_v33, %v845_v34  ;;  %v2171_v34 = vld [vmem:[#allocation2 + $0x228] sm:$0xff] }
  0x9d   :  { %v1565_v57 = vpop.eup %1564  ;;  %1356 = vst [vmem:[#allocation5 + $0x1a8] sm:$0xff] %v1228_v32  ;;  %1572 = vtanh.f32 %v723_v53  ;;  %v724_v58 = vmul.f32 0.7978846, %v596_v36  ;;  %v1230_v9 = vmul.f32 %v1102_v35, %v846_v48  ;;  %v850_v16 = vmul.f32 0.5, %v2117_v38  ;;  %v2190_v35 = vld [vmem:[#allocation2 + $0x238] sm:$0xff] }
  0x9e   :  { %v1103_v6 = vadd.f32 1.0, %v1565_v57  ;;  %v725_v8 = vmul.f32 0.7978846, %v597_v37  ;;  %v598_v19 = vmul.f32 %v470_v41, %v2135_v55  ;;  %v1567_v5 = vpop.eup %1566  ;;  %1357 = vst [vmem:[#allocation5 + $0x1b0] sm:$0xff] %v1229_v62  ;;  %v471_v49 = vadd.f32 1.0, %v343_v43 }
  0x9f   :  { %1574 = vtanh.f32 %v724_v58  ;;  %v216_v20 = vmul.f32 %v2154_v46, %v2154_v46  ;;  %1358 = vst [vmem:[#allocation5 + $0x1b8] sm:$0xff] %v1230_v9  ;;  %v1104_v18 = vadd.f32 1.0, %v1567_v5  ;;  %v851_v22 = vmul.f32 0.5, %v2123_v42 }
  0xa0   :  { %v1231_v7 = vmul.f32 %v1103_v6, %v847_v26  ;;  %1576 = vtanh.f32 %v725_v8  ;;  %v726_v1 = vmul.f32 0.7978846, %v598_v19  ;;  %v599_v52 = vmul.f32 %v471_v49, %v2147_v28  ;;  %v2194_v6 = vld [vmem:[#allocation2 + $0x240] sm:$0xff] }
  0xa1   :  { %v344_v40 = vmul.f32 0.044715, %v216_v20  ;;  %v217_v38 = vmul.f32 %v2158_v44, %v2158_v44  ;;  %v1569_v24 = vpop.eup %1568  ;;  %v1232_v10 = vmul.f32 %v1104_v18, %v848_v27  ;;  %v852_v48 = vmul.f32 0.5, %v2127_v60  ;;  %v2181_v60 = vld [vmem:[#allocation2 + $0x230] sm:$0xff] }
  0xa2   :  { %1359 = vst [vmem:[#allocation5 + $0x1c0] sm:$0xff] %v1231_v7  ;;  %1578 = vtanh.f32 %v726_v1  ;;  %v218_v54 = vmul.f32 %v2163_v56, %v2163_v56  ;;  %v1105_v42 = vadd.f32 1.0, %v1569_v24  ;;  %v727_v25 = vmul.f32 0.7978846, %v599_v52 }
  0xa3   :  { %v472_v26 = vadd.f32 1.0, %v344_v40  ;;  %v345_v47 = vmul.f32 0.044715, %v217_v38  ;;  %1360 = vst [vmem:[#allocation5 + $0x1c8] sm:$0xff] %v1232_v10  ;;  %v853_v45 = vmul.f32 0.5, %v2131_v59  ;;  %v219_v0 = vmul.f32 %v2169_v3, %v2169_v3  ;;  %v2204_v40 = vld [vmem:[#allocation2 + $0x250] sm:$0xff] }
  0xa4   :  { %v1571_v2 = vpop.eup %1570  ;;  %v346_v14 = vmul.f32 0.044715, %v218_v54  ;;  %v220_v27 = vmul.f32 %v2171_v34, %v2171_v34  ;;  %v1233_v11 = vmul.f32 %v1105_v42, %v849_v63  ;;  %1580 = vtanh.f32 %v727_v25  ;;  %v2209_v25 = vld [vmem:[#allocation2 + $0x258] sm:$0xff] }
  0xa5   :  { %v1106_v39 = vadd.f32 1.0, %v1571_v2  ;;  %v600_v29 = vmul.f32 %v472_v26, %v2154_v46  ;;  %v473_v21 = vadd.f32 1.0, %v345_v47  ;;  %v347_v61 = vmul.f32 0.044715, %v219_v0 }
  0xa6   :  { %v474_v51 = vadd.f32 1.0, %v346_v14  ;;  %v348_v23 = vmul.f32 0.044715, %v220_v27  ;;  %1361 = vst [vmem:[#allocation5 + $0x1d0] sm:$0xff] %v1233_v11  ;;  %v854_v13 = vmul.f32 0.5, %v2135_v55  ;;  %v221_v30 = vmul.f32 %v2181_v60, %v2181_v60  ;;  %v2214_v14 = vld [vmem:[#allocation2 + $0x260] sm:$0xff] }
  0xa7   :  { %v1573_v12 = vpop.eup %1572  ;;  %v1234_v59 = vmul.f32 %v1106_v39, %v850_v16  ;;  %v728_v50 = vmul.f32 0.7978846, %v600_v29  ;;  %v601_v4 = vmul.f32 %v473_v21, %v2158_v44  ;;  %v475_v15 = vadd.f32 1.0, %v347_v61  ;;  %v2199_v16 = vld [vmem:[#allocation2 + $0x248] sm:$0xff] }
  0xa8   :  { %v1107_v31 = vadd.f32 1.0, %v1573_v12  ;;  %v602_v17 = vmul.f32 %v474_v51, %v2163_v56  ;;  %v855_v33 = vmul.f32 0.5, %v2147_v28  ;;  %v476_v53 = vadd.f32 1.0, %v348_v23 }
  0xa9   :  { %v1575_v32 = vpop.eup %1574  ;;  %1362 = vst [vmem:[#allocation5 + $0x1d8] sm:$0xff] %v1234_v59  ;;  %1582 = vtanh.f32 %v728_v50  ;;  %v349_v36 = vmul.f32 0.044715, %v221_v30  ;;  %v729_v43 = vmul.f32 0.7978846, %v601_v4  ;;  %v603_v63 = vmul.f32 %v475_v15, %v2169_v3  ;;  %v2225_v30 = vld [vmem:[#allocation2 + $0x268] sm:$0xff] }
  0xaa   :  { %v1577_v55 = vpop.eup %1576  ;;  %v1235_v37 = vmul.f32 %v1107_v31, %v851_v22  ;;  %v1108_v41 = vadd.f32 1.0, %v1575_v32  ;;  %v730_v57 = vmul.f32 0.7978846, %v602_v17  ;;  %v604_v58 = vmul.f32 %v476_v53, %v2171_v34 }
  0xab   :  { %v1109_v62 = vadd.f32 1.0, %v1577_v55  ;;  %v477_v9 = vadd.f32 1.0, %v349_v36  ;;  %v856_v19 = vmul.f32 0.5, %v2154_v46  ;;  %1584 = vtanh.f32 %v729_v43 }
  0xac   :  { %v1579_v8 = vpop.eup %1578  ;;  %1363 = vst [vmem:[#allocation5 + $0x1e0] sm:$0xff] %v1235_v37  ;;  %v1236_v28 = vmul.f32 %v1108_v41, %v852_v48  ;;  %v222_v5 = vmul.f32 %v2190_v35, %v2190_v35  ;;  %1586 = vtanh.f32 %v730_v57  ;;  %v731_v7 = vmul.f32 0.7978846, %v603_v63 }
  0xad   :  { %v1237_v49 = vmul.f32 %v1109_v62, %v853_v45  ;;  %v1110_v20 = vadd.f32 1.0, %v1579_v8  ;;  %v732_v18 = vmul.f32 0.7978846, %v604_v58  ;;  %v605_v1 = vmul.f32 %v477_v9, %v2181_v60  ;;  %v2232_v58 = vld [vmem:[#allocation2 + $0x270] sm:$0xff] }
  0xae   :  { %1364 = vst [vmem:[#allocation5 + $0x1e8] sm:$0xff] %v1236_v28  ;;  %v350_v22 = vmul.f32 0.044715, %v222_v5  ;;  %v223_v52 = vmul.f32 %v2194_v6, %v2194_v6  ;;  %v1581_v46 = vpop.eup %1580  ;;  %v857_v24 = vmul.f32 0.5, %v2158_v44  ;;  %1588 = vtanh.f32 %v731_v7  ;;  %v2236_v7 = vld [vmem:[#allocation2 + $0x278] sm:$0xff] }
  0xaf   :  { %1365 = vst [vmem:[#allocation5 + $0x1f0] sm:$0xff] %v1237_v49  ;;  %v1238_v38 = vmul.f32 %v1110_v20, %v854_v13  ;;  %v224_v10 = vmul.f32 %v2199_v16, %v2199_v16  ;;  %v1111_v48 = vadd.f32 1.0, %v1581_v46  ;;  %1590 = vtanh.f32 %v732_v18  ;;  %v2241_v46 = vld [vmem:[#allocation2 + $0x280] sm:$0xff] }
  0xb0   :  { %v733_v54 = vmul.f32 0.7978846, %v605_v1  ;;  %v478_v42 = vadd.f32 1.0, %v350_v22  ;;  %v858_v26 = vmul.f32 0.5, %v2163_v56  ;;  %v351_v47 = vmul.f32 0.044715, %v223_v52 }
  0xb1   :  { %1366 = vst [vmem:[#allocation5 + $0x1f8] sm:$0xff] %v1238_v38  ;;  %v352_v2 = vmul.f32 0.044715, %v224_v10  ;;  %v225_v45 = vmul.f32 %v2204_v40, %v2204_v40  ;;  %v1239_v44 = vmul.f32 %v1111_v48, %v855_v33  ;;  %v859_v0 = vmul.f32 0.5, %v2169_v3 }
  0xb2   :  { %1592 = vtanh.f32 %v733_v54  ;;  %v606_v27 = vmul.f32 %v478_v42, %v2190_v35  ;;  %v479_v39 = vadd.f32 1.0, %v351_v47  ;;  %v226_v56 = vmul.f32 %v2209_v25, %v2209_v25  ;;  %v2243_v54 = vld [vmem:[#allocation2 + $0x288] sm:$0xff] }
  0xb3   :  { %v1583_v11 = vpop.eup %1582  ;;  %v480_v29 = vadd.f32 1.0, %v352_v2  ;;  %v353_v21 = vmul.f32 0.044715, %v225_v45  ;;  %1367 = vst [vmem:[#allocation5 + $0x200] sm:$0xff] %v1239_v44  ;;  %v860_v61 = vmul.f32 0.5, %v2171_v34  ;;  %v227_v12 = vmul.f32 %v2214_v14, %v2214_v14  ;;  %v2251_v44 = vld [vmem:[#allocation2 + $0x290] sm:$0xff] }
  0xb4   :  { %v1112_v51 = vadd.f32 1.0, %v1583_v11  ;;  %v734_v23 = vmul.f32 0.7978846, %v606_v27  ;;  %v607_v3 = vmul.f32 %v479_v39, %v2194_v6  ;;  %v354_v50 = vmul.f32 0.044715, %v226_v56 }
  0xb5   :  { %v608_v59 = vmul.f32 %v480_v29, %v2199_v16  ;;  %v481_v13 = vadd.f32 1.0, %v353_v21  ;;  %v1585_v31 = vpop.eup %1584  ;;  %v861_v17 = vmul.f32 0.5, %v2181_v60  ;;  %v355_v15 = vmul.f32 0.044715, %v227_v12 }
  0xb6   :  { %v1240_v4 = vmul.f32 %v1112_v51, %v856_v19  ;;  %1594 = vtanh.f32 %v734_v23  ;;  %v1587_v32 = vpop.eup %1586  ;;  %v1113_v34 = vadd.f32 1.0, %v1585_v31  ;;  %v735_v33 = vmul.f32 0.7978846, %v607_v3 }
  0xb7   :  { %v736_v53 = vmul.f32 0.7978846, %v608_v59  ;;  %v609_v36 = vmul.f32 %v481_v13, %v2204_v40  ;;  %v1114_v55 = vadd.f32 1.0, %v1587_v32  ;;  %v482_v37 = vadd.f32 1.0, %v354_v50  ;;  %v2260_v59 = vld [vmem:[#allocation2 + $0x298] sm:$0xff] }
  0xb8   :  { %1368 = vst [vmem:[#allocation5 + $0x208] sm:$0xff] %v1240_v4  ;;  %v483_v41 = vadd.f32 1.0, %v355_v15  ;;  %v228_v43 = vmul.f32 %v2225_v30, %v2225_v30  ;;  %v1589_v57 = vpop.eup %1588  ;;  %v1241_v62 = vmul.f32 %v1113_v34, %v857_v24  ;;  %v862_v63 = vmul.f32 0.5, %v2190_v35 }
  0xb9   :  { %1596 = vtanh.f32 %v735_v33  ;;  %v737_v60 = vmul.f32 0.7978846, %v609_v36  ;;  %v1591_v9 = vpop.eup %1590  ;;  %v1242_v8 = vmul.f32 %v1114_v55, %v858_v26  ;;  %v1115_v28 = vadd.f32 1.0, %v1589_v57 }
  0xba   :  { %1598 = vtanh.f32 %v736_v53  ;;  %v610_v19 = vmul.f32 %v482_v37, %v2209_v25  ;;  %1369 = vst [vmem:[#allocation5 + $0x210] sm:$0xff] %v1241_v62  ;;  %v1116_v5 = vadd.f32 1.0, %v1591_v9  ;;  %v611_v49 = vmul.f32 %v483_v41, %v2214_v14 }
  0xbb   :  { %1600 = vtanh.f32 %v737_v60  ;;  %v356_v20 = vmul.f32 0.044715, %v228_v43  ;;  %1370 = vst [vmem:[#allocation5 + $0x218] sm:$0xff] %v1242_v8  ;;  %v1243_v35 = vmul.f32 %v1115_v28, %v859_v0  ;;  %v863_v1 = vmul.f32 0.5, %v2194_v6  ;;  %v2268_v60 = vld [vmem:[#allocation2 + $0x2a0] sm:$0xff] }
  0xbc   :  { %v1593_v18 = vpop.eup %1592  ;;  %v738_v22 = vmul.f32 0.7978846, %v610_v19  ;;  %v229_v52 = vmul.f32 %v2232_v58, %v2232_v58  ;;  %v1244_v38 = vmul.f32 %v1116_v5, %v860_v61  ;;  %v739_v10 = vmul.f32 0.7978846, %v611_v49  ;;  %v2271_v5 = vld [vmem:[#allocation2 + $0x2a8] sm:$0xff] }
  0xbd   :  { %v1117_v24 = vadd.f32 1.0, %v1593_v18  ;;  %v484_v48 = vadd.f32 1.0, %v356_v20  ;;  %1371 = vst [vmem:[#allocation5 + $0x220] sm:$0xff] %v1243_v35  ;;  %v864_v42 = vmul.f32 0.5, %v2199_v16  ;;  %v230_v6 = vmul.f32 %v2236_v7, %v2236_v7 }
  0xbe   :  { %1602 = vtanh.f32 %v738_v22  ;;  %v357_v26 = vmul.f32 0.044715, %v229_v52  ;;  %1372 = vst [vmem:[#allocation5 + $0x228] sm:$0xff] %v1244_v38  ;;  %v231_v45 = vmul.f32 %v2241_v46, %v2241_v46  ;;  %v865_v27 = vmul.f32 0.5, %v2204_v40 }
  0xbf   :  { %v1245_v47 = vmul.f32 %v1117_v24, %v861_v17  ;;  %1604 = vtanh.f32 %v739_v10  ;;  %v612_v2 = vmul.f32 %v484_v48, %v2225_v30  ;;  %v358_v16 = vmul.f32 0.044715, %v230_v6 }
  0xc0   :  { %v1595_v0 = vpop.eup %1594  ;;  %v485_v11 = vadd.f32 1.0, %v357_v26  ;;  %v232_v39 = vmul.f32 %v2243_v54, %v2243_v54  ;;  %v866_v21 = vmul.f32 0.5, %v2209_v25  ;;  %v359_v51 = vmul.f32 0.044715, %v231_v45 }
  0xc1   :  { %1373 = vst [vmem:[#allocation5 + $0x230] sm:$0xff] %v1245_v47  ;;  %v1118_v29 = vadd.f32 1.0, %v1595_v0  ;;  %v740_v56 = vmul.f32 0.7978846, %v612_v2  ;;  %v486_v23 = vadd.f32 1.0, %v358_v16  ;;  %v233_v3 = vmul.f32 %v2251_v44, %v2251_v44  ;;  %v2285_v2 = vld [vmem:[#allocation2 + $0x2c0] sm:$0xff] }
  0xc2   :  { %v613_v61 = vmul.f32 %v485_v11, %v2232_v58  ;;  %v360_v12 = vmul.f32 0.044715, %v232_v39  ;;  %v867_v50 = vmul.f32 0.5, %v2214_v14  ;;  %v487_v31 = vadd.f32 1.0, %v359_v51 }
  0xc3   :  { %v1597_v40 = vpop.eup %1596  ;;  %v1246_v13 = vmul.f32 %v1118_v29, %v862_v63  ;;  %1606 = vtanh.f32 %v740_v56  ;;  %v614_v15 = vmul.f32 %v486_v23, %v2236_v7  ;;  %v361_v36 = vmul.f32 0.044715, %v233_v3 }
  0xc4   :  { %v1599_v4 = vpop.eup %1598  ;;  %v1119_v17 = vadd.f32 1.0, %v1597_v40  ;;  %v741_v25 = vmul.f32 0.7978846, %v613_v61  ;;  %v488_v32 = vadd.f32 1.0, %v360_v12  ;;  %v615_v53 = vmul.f32 %v487_v31, %v2241_v46 }
  0xc5   :  { %v1601_v34 = vpop.eup %1600  ;;  %1374 = vst [vmem:[#allocation5 + $0x238] sm:$0xff] %v1246_v13  ;;  %v1120_v33 = vadd.f32 1.0, %v1599_v4  ;;  %v234_v55 = vmul.f32 %v2260_v59, %v2260_v59  ;;  %v742_v14 = vmul.f32 0.7978846, %v614_v15  ;;  %v489_v63 = vadd.f32 1.0, %v361_v36 }
  0xc6   :  { %v1247_v37 = vmul.f32 %v1119_v17, %v863_v1  ;;  %v1121_v41 = vadd.f32 1.0, %v1601_v34  ;;  %1608 = vtanh.f32 %v741_v25  ;;  %v743_v57 = vmul.f32 0.7978846, %v615_v53 }
  0xc7   :  { %v1248_v43 = vmul.f32 %v1120_v33, %v864_v42  ;;  %v616_v62 = vmul.f32 %v488_v32, %v2243_v54  ;;  %v868_v28 = vmul.f32 0.5, %v2225_v30  ;;  %1610 = vtanh.f32 %v742_v14  ;;  %v2277_v30 = vld [vmem:[#allocation2 + $0x2b0] sm:$0xff]  ;;  %v2281_v42 = vld [vmem:[#allocation2 + $0x2b8] sm:$0xff] }
  0xc8   :  { %v1603_v9 = vpop.eup %1602  ;;  %1375 = vst [vmem:[#allocation5 + $0x240] sm:$0xff] %v1247_v37  ;;  %v1249_v8 = vmul.f32 %v1121_v41, %v865_v27  ;;  %v362_v19 = vmul.f32 0.044715, %v234_v55  ;;  %1612 = vtanh.f32 %v743_v57  ;;  %v617_v35 = vmul.f32 %v489_v63, %v2251_v44 }
  0xc9   :  { %v1605_v49 = vpop.eup %1604  ;;  %1376 = vst [vmem:[#allocation5 + $0x248] sm:$0xff] %v1248_v43  ;;  %v1122_v20 = vadd.f32 1.0, %v1603_v9  ;;  %v744_v18 = vmul.f32 0.7978846, %v616_v62  ;;  %v869_v22 = vmul.f32 0.5, %v2232_v58  ;;  %v235_v38 = vmul.f32 %v2268_v60, %v2268_v60  ;;  %v2304_v43 = vld [vmem:[#allocation2 + $0x2d0] sm:$0xff] }
  0xca   :  { %1377 = vst [vmem:[#allocation5 + $0x250] sm:$0xff] %v1249_v8  ;;  %v1123_v1 = vadd.f32 1.0, %v1605_v49  ;;  %v490_v52 = vadd.f32 1.0, %v362_v19  ;;  %v745_v10 = vmul.f32 0.7978846, %v617_v35  ;;  %v236_v48 = vmul.f32 %v2271_v5, %v2271_v5  ;;  %v2307_v49 = vld [vmem:[#allocation2 + $0x2d8] sm:$0xff] }
  0xcb   :  { %v1250_v24 = vmul.f32 %v1122_v20, %v866_v21  ;;  %1614 = vtanh.f32 %v744_v18  ;;  %v870_v6 = vmul.f32 0.5, %v2236_v7  ;;  %v363_v58 = vmul.f32 0.044715, %v235_v38 }
  0xcc   :  { %v1251_v26 = vmul.f32 %v1123_v1, %v867_v50  ;;  %v618_v47 = vmul.f32 %v490_v52, %v2260_v59  ;;  %v871_v0 = vmul.f32 0.5, %v2241_v46  ;;  %1616 = vtanh.f32 %v745_v10  ;;  %v2295_v46 = vld [vmem:[#allocation2 + $0x2c8] sm:$0xff] }
  0xcd   :  { %v1607_v45 = vpop.eup %1606  ;;  %1378 = vst [vmem:[#allocation5 + $0x258] sm:$0xff] %v1250_v24  ;;  %v364_v27 = vmul.f32 0.044715, %v236_v48  ;;  %v237_v11 = vmul.f32 %v2277_v30, %v2277_v30  ;;  %v491_v29 = vadd.f32 1.0, %v363_v58  ;;  %v238_v7 = vmul.f32 %v2281_v42, %v2281_v42 }
  0xce   :  { %1379 = vst [vmem:[#allocation5 + $0x260] sm:$0xff] %v1251_v26  ;;  %v1124_v16 = vadd.f32 1.0, %v1607_v45  ;;  %v746_v39 = vmul.f32 0.7978846, %v618_v47  ;;  %v872_v21 = vmul.f32 0.5, %v2243_v54  ;;  %v239_v61 = vmul.f32 %v2285_v2, %v2285_v2 }
  0xcf   :  { %v492_v56 = vadd.f32 1.0, %v364_v27  ;;  %v365_v51 = vmul.f32 0.044715, %v237_v11  ;;  %v619_v3 = vmul.f32 %v491_v29, %v2268_v60  ;;  %v366_v40 = vmul.f32 0.044715, %v238_v7  ;;  %v2323_v27 = vld [vmem:[#allocation2 + $0x2f0] sm:$0xff] }
  0xd0   :  { %v1609_v23 = vpop.eup %1608  ;;  %v1252_v12 = vmul.f32 %v1124_v16, %v868_v28  ;;  %1618 = vtanh.f32 %v746_v39  ;;  %v367_v4 = vmul.f32 0.044715, %v239_v61  ;;  %v873_v54 = vmul.f32 0.5, %v2251_v44 }
  0xd1   :  { %v1125_v13 = vadd.f32 1.0, %v1609_v23  ;;  %v620_v50 = vmul.f32 %v492_v56, %v2271_v5  ;;  %v493_v31 = vadd.f32 1.0, %v365_v51  ;;  %v1611_v17 = vpop.eup %1610  ;;  %v747_v25 = vmul.f32 0.7978846, %v619_v3 }
  0xd2   :  { %1380 = vst [vmem:[#allocation5 + $0x268] sm:$0xff] %v1252_v12  ;;  %v494_v15 = vadd.f32 1.0, %v366_v40  ;;  %v240_v32 = vmul.f32 %v2295_v46, %v2295_v46  ;;  %v1613_v34 = vpop.eup %1612  ;;  %v1126_v53 = vadd.f32 1.0, %v1611_v17  ;;  %v495_v14 = vadd.f32 1.0, %v367_v4 }
  0xd3   :  { %v1253_v33 = vmul.f32 %v1125_v13, %v869_v22  ;;  %v748_v36 = vmul.f32 0.7978846, %v620_v50  ;;  %v621_v55 = vmul.f32 %v493_v31, %v2277_v30  ;;  %v1127_v37 = vadd.f32 1.0, %v1613_v34  ;;  %v2312_v22 = vld [vmem:[#allocation2 + $0x2e0] sm:$0xff] }
  0xd4   :  { %1620 = vtanh.f32 %v747_v25  ;;  %v622_v41 = vmul.f32 %v494_v15, %v2281_v42  ;;  %v1254_v44 = vmul.f32 %v1126_v53, %v870_v6  ;;  %v368_v63 = vmul.f32 0.044715, %v240_v32  ;;  %v2318_v6 = vld [vmem:[#allocation2 + $0x2e8] sm:$0xff] }
  0xd5   :  { %v1615_v57 = vpop.eup %1614  ;;  %1381 = vst [vmem:[#allocation5 + $0x270] sm:$0xff] %v1253_v33  ;;  %1622 = vtanh.f32 %v748_v36  ;;  %v749_v62 = vmul.f32 0.7978846, %v621_v55  ;;  %v1255_v9 = vmul.f32 %v1127_v37, %v871_v0  ;;  %v623_v19 = vmul.f32 %v495_v14, %v2285_v2 }
  0xd6   :  { %v1128_v8 = vadd.f32 1.0, %v1615_v57  ;;  %v750_v28 = vmul.f32 0.7978846, %v622_v41  ;;  %v1617_v20 = vpop.eup %1616  ;;  %1382 = vst [vmem:[#allocation5 + $0x278] sm:$0xff] %v1254_v44  ;;  %v874_v18 = vmul.f32 0.5, %v2260_v59  ;;  %v496_v35 = vadd.f32 1.0, %v368_v63 }
  0xd7   :  { %1624 = vtanh.f32 %v749_v62  ;;  %v241_v1 = vmul.f32 %v2304_v43, %v2304_v43  ;;  %1383 = vst [vmem:[#allocation5 + $0x280] sm:$0xff] %v1255_v9  ;;  %v1129_v38 = vadd.f32 1.0, %v1617_v20  ;;  %v751_v24 = vmul.f32 0.7978846, %v623_v19  ;;  %v2340_v63 = vld [vmem:[#allocation2 + $0x300] sm:$0xff]  ;;  %v2342_v9 = vld [vmem:[#allocation2 + $0x308] sm:$0xff] }
  0xd8   :  { %v1256_v52 = vmul.f32 %v1128_v8, %v872_v21  ;;  %1626 = vtanh.f32 %v750_v28  ;;  %v875_v10 = vmul.f32 0.5, %v2268_v60  ;;  %v624_v48 = vmul.f32 %v496_v35, %v2295_v46 }
  0xd9   :  { %v369_v26 = vmul.f32 0.044715, %v241_v1  ;;  %v242_v59 = vmul.f32 %v2307_v49, %v2307_v49  ;;  %v1257_v58 = vmul.f32 %v1129_v38, %v873_v54  ;;  %v876_v45 = vmul.f32 0.5, %v2271_v5  ;;  %v2329_v5 = vld [vmem:[#allocation2 + $0x2f8] sm:$0xff] }
  0xda   :  { %v1619_v47 = vpop.eup %1618  ;;  %1384 = vst [vmem:[#allocation5 + $0x288] sm:$0xff] %v1256_v52  ;;  %1628 = vtanh.f32 %v751_v24  ;;  %v243_v0 = vmul.f32 %v2312_v22, %v2312_v22  ;;  %v752_v11 = vmul.f32 0.7978846, %v624_v48  ;;  %v877_v29 = vmul.f32 0.5, %v2277_v30  ;;  %v2346_v52 = vld [vmem:[#allocation2 + $0x310] sm:$0xff]  ;;  %v2353_v48 = vld [vmem:[#allocation2 + $0x318] sm:$0xff] }
  0xdb   :  { %v1130_v60 = vadd.f32 1.0, %v1619_v47  ;;  %v497_v16 = vadd.f32 1.0, %v369_v26  ;;  %v370_v39 = vmul.f32 0.044715, %v242_v59  ;;  %1385 = vst [vmem:[#allocation5 + $0x290] sm:$0xff] %v1257_v58  ;;  %v878_v7 = vmul.f32 0.5, %v2281_v42 }
  0xdc   :  { %v371_v21 = vmul.f32 0.044715, %v243_v0  ;;  %v244_v56 = vmul.f32 %v2318_v6, %v2318_v6  ;;  %1630 = vtanh.f32 %v752_v11  ;;  %v879_v3 = vmul.f32 0.5, %v2285_v2 }
  0xdd   :  { %v1258_v51 = vmul.f32 %v1130_v60, %v874_v18  ;;  %v625_v61 = vmul.f32 %v497_v16, %v2304_v43  ;;  %v498_v23 = vadd.f32 1.0, %v370_v39  ;;  %v245_v30 = vmul.f32 %v2323_v27, %v2323_v27  ;;  %v2358_v16 = vld [vmem:[#allocation2 + $0x320] sm:$0xff] }
  0xde   :  { %v1621_v12 = vpop.eup %1620  ;;  %v499_v40 = vadd.f32 1.0, %v371_v21  ;;  %v372_v13 = vmul.f32 0.044715, %v244_v56  ;;  %v246_v17 = vmul.f32 %v2329_v5, %v2329_v5  ;;  %v880_v38 = vmul.f32 0.5, %v2295_v46 }
  0xdf   :  { %v1623_v42 = vpop.eup %1622  ;;  %1386 = vst [vmem:[#allocation5 + $0x298] sm:$0xff] %v1258_v51  ;;  %v1131_v50 = vadd.f32 1.0, %v1621_v12  ;;  %v753_v31 = vmul.f32 0.7978846, %v625_v61  ;;  %v626_v4 = vmul.f32 %v498_v23, %v2307_v49  ;;  %v373_v32 = vmul.f32 0.044715, %v245_v30 }
  0xe0   :  { %v1132_v54 = vadd.f32 1.0, %v1623_v42  ;;  %v627_v25 = vmul.f32 %v499_v40, %v2312_v22  ;;  %v500_v15 = vadd.f32 1.0, %v372_v13  ;;  %v374_v53 = vmul.f32 0.044715, %v246_v17  ;;  %v2374_v17 = vld [vmem:[#allocation2 + $0x330] sm:$0xff] }
  0xe1   :  { %v1625_v2 = vpop.eup %1624  ;;  %v1259_v34 = vmul.f32 %v1131_v50, %v875_v10  ;;  %1632 = vtanh.f32 %v753_v31  ;;  %v754_v33 = vmul.f32 0.7978846, %v626_v4  ;;  %v501_v44 = vadd.f32 1.0, %v373_v32 }
  0xe2   :  { %v1627_v36 = vpop.eup %1626  ;;  %v1260_v55 = vmul.f32 %v1132_v54, %v876_v45  ;;  %v1133_v37 = vadd.f32 1.0, %v1625_v2  ;;  %v755_v41 = vmul.f32 0.7978846, %v627_v25  ;;  %v628_v14 = vmul.f32 %v500_v15, %v2318_v6 }
  0xe3   :  { %1387 = vst [vmem:[#allocation5 + $0x2a0] sm:$0xff] %v1259_v34  ;;  %v1134_v57 = vadd.f32 1.0, %v1627_v36  ;;  %1634 = vtanh.f32 %v754_v33  ;;  %v502_v62 = vadd.f32 1.0, %v374_v53  ;;  %v629_v35 = vmul.f32 %v501_v44, %v2323_v27 }
  0xe4   :  { %v1629_v8 = vpop.eup %1628  ;;  %1388 = vst [vmem:[#allocation5 + $0x2a8] sm:$0xff] %v1260_v55  ;;  %v1261_v28 = vmul.f32 %v1133_v37, %v877_v29  ;;  %1636 = vtanh.f32 %v755_v41  ;;  %v756_v19 = vmul.f32 0.7978846, %v628_v14  ;;  %v247_v24 = vmul.f32 %v2340_v63, %v2340_v63  ;;  %v2380_v14 = vld [vmem:[#allocation2 + $0x338] sm:$0xff] }
  0xe5   :  { %v1262_v20 = vmul.f32 %v1134_v57, %v878_v7  ;;  %v1135_v18 = vadd.f32 1.0, %v1629_v8  ;;  %v630_v1 = vmul.f32 %v502_v62, %v2329_v5  ;;  %v248_v10 = vmul.f32 %v2342_v9, %v2342_v9 }
  0xe6   :  { %1389 = vst [vmem:[#allocation5 + $0x2b0] sm:$0xff] %v1261_v28  ;;  %1638 = vtanh.f32 %v756_v19  ;;  %v1631_v26 = vpop.eup %1630  ;;  %v881_v47 = vmul.f32 0.5, %v2304_v43  ;;  %v757_v58 = vmul.f32 0.7978846, %v629_v35  ;;  %v375_v60 = vmul.f32 0.044715, %v247_v24 }
  0xe7   :  { %1390 = vst [vmem:[#allocation5 + $0x2b8] sm:$0xff] %v1262_v20  ;;  %v1263_v59 = vmul.f32 %v1135_v18, %v879_v3  ;;  %v758_v45 = vmul.f32 0.7978846, %v630_v1  ;;  %v1136_v0 = vadd.f32 1.0, %v1631_v26  ;;  %v376_v11 = vmul.f32 0.044715, %v248_v10 }
  0xe8   :  { %v249_v46 = vmul.f32 %v2346_v52, %v2346_v52  ;;  %v882_v39 = vmul.f32 0.5, %v2307_v49  ;;  %v883_v29 = vmul.f32 0.5, %v2312_v22  ;;  %1640 = vtanh.f32 %v757_v58  ;;  %v2364_v43 = vld [vmem:[#allocation2 + $0x328] sm:$0xff]  ;;  %v2386_v24 = vld [vmem:[#allocation2 + $0x340] sm:$0xff] }
  0xe9   :  { %1391 = vst [vmem:[#allocation5 + $0x2c0] sm:$0xff] %v1263_v59  ;;  %v250_v7 = vmul.f32 %v2353_v48, %v2353_v48  ;;  %v1264_v21 = vmul.f32 %v1136_v0, %v880_v38  ;;  %1642 = vtanh.f32 %v758_v45  ;;  %v503_v56 = vadd.f32 1.0, %v375_v60 }
  0xea   :  { %v504_v51 = vadd.f32 1.0, %v376_v11  ;;  %v884_v23 = vmul.f32 0.5, %v2318_v6  ;;  %v377_v12 = vmul.f32 0.044715, %v249_v46  ;;  %v251_v49 = vmul.f32 %v2358_v16, %v2358_v16  ;;  %v2390_v11 = vld [vmem:[#allocation2 + $0x348] sm:$0xff] }
  0xeb   :  { %v1633_v61 = vpop.eup %1632  ;;  %v378_v3 = vmul.f32 0.044715, %v250_v7  ;;  %1392 = vst [vmem:[#allocation5 + $0x2c8] sm:$0xff] %v1264_v21  ;;  %v631_v40 = vmul.f32 %v503_v56, %v2340_v63  ;;  %v252_v30 = vmul.f32 %v2364_v43, %v2364_v43  ;;  %v885_v50 = vmul.f32 0.5, %v2323_v27 }
  0xec   :  { %v1137_v22 = vadd.f32 1.0, %v1633_v61  ;;  %v632_v13 = vmul.f32 %v504_v51, %v2342_v9  ;;  %v505_v31 = vadd.f32 1.0, %v377_v12  ;;  %v379_v6 = vmul.f32 0.044715, %v251_v49  ;;  %v2398_v61 = vld [vmem:[#allocation2 + $0x358] sm:$0xff] }
  0xed   :  { %v1635_v42 = vpop.eup %1634  ;;  %v506_v4 = vadd.f32 1.0, %v378_v3  ;;  %v759_v32 = vmul.f32 0.7978846, %v631_v40  ;;  %v380_v27 = vmul.f32 0.044715, %v252_v30  ;;  %v253_v41 = vmul.f32 %v2374_v17, %v2374_v17 }
  0xee   :  { %v1637_v54 = vpop.eup %1636  ;;  %v1265_v25 = vmul.f32 %v1137_v22, %v881_v47  ;;  %v1138_v15 = vadd.f32 1.0, %v1635_v42  ;;  %v760_v2 = vmul.f32 0.7978846, %v632_v13  ;;  %v633_v33 = vmul.f32 %v505_v31, %v2346_v52 }
  0xef   :  { %v1139_v34 = vadd.f32 1.0, %v1637_v54  ;;  %v634_v53 = vmul.f32 %v506_v4, %v2353_v48  ;;  %v507_v36 = vadd.f32 1.0, %v379_v6  ;;  %1644 = vtanh.f32 %v759_v32 }
  0xf0   :  { %v1639_v55 = vpop.eup %1638  ;;  %1393 = vst [vmem:[#allocation5 + $0x2d0] sm:$0xff] %v1265_v25  ;;  %v1266_v37 = vmul.f32 %v1138_v15, %v882_v39  ;;  %1646 = vtanh.f32 %v760_v2  ;;  %v761_v62 = vmul.f32 0.7978846, %v633_v33  ;;  %v508_v19 = vadd.f32 1.0, %v380_v27 }
  0xf1   :  { %v1267_v57 = vmul.f32 %v1139_v34, %v883_v29  ;;  %v1140_v44 = vadd.f32 1.0, %v1639_v55  ;;  %v762_v8 = vmul.f32 0.7978846, %v634_v53  ;;  %v635_v28 = vmul.f32 %v507_v36, %v2358_v16  ;;  %v2394_v29 = vld [vmem:[#allocation2 + $0x350] sm:$0xff] }
  0xf2   :  { %1394 = vst [vmem:[#allocation5 + $0x2d8] sm:$0xff] %v1266_v37  ;;  %v381_v20 = vmul.f32 0.044715, %v253_v41  ;;  %v1641_v18 = vpop.eup %1640  ;;  %v886_v1 = vmul.f32 0.5, %v2329_v5  ;;  %1648 = vtanh.f32 %v761_v62  ;;  %v254_v38 = vmul.f32 %v2380_v14, %v2380_v14 }
  0xf3   :  { %1395 = vst [vmem:[#allocation5 + $0x2e0] sm:$0xff] %v1267_v57  ;;  %v1268_v35 = vmul.f32 %v1140_v44, %v884_v23  ;;  %v1643_v10 = vpop.eup %1642  ;;  %v1141_v26 = vadd.f32 1.0, %v1641_v18  ;;  %1650 = vtanh.f32 %v762_v8  ;;  %v763_v59 = vmul.f32 0.7978846, %v635_v28  ;;  %v2417_v8 = vld [vmem:[#allocation2 + $0x368] sm:$0xff] }
  0xf4   :  { %v636_v47 = vmul.f32 %v508_v19, %v2364_v43  ;;  %v1142_v58 = vadd.f32 1.0, %v1643_v10  ;;  %v887_v45 = vmul.f32 0.5, %v2340_v63  ;;  %v509_v0 = vadd.f32 1.0, %v381_v20 }
  0xf5   :  { %1396 = vst [vmem:[#allocation5 + $0x2e8] sm:$0xff] %v1268_v35  ;;  %v382_v60 = vmul.f32 0.044715, %v254_v38  ;;  %v1269_v5 = vmul.f32 %v1141_v26, %v885_v50  ;;  %1652 = vtanh.f32 %v763_v59  ;;  %v255_v39 = vmul.f32 %v2386_v24, %v2386_v24  ;;  %v2410_v50 = vld [vmem:[#allocation2 + $0x360] sm:$0xff]  ;;  %v2421_v26 = vld [vmem:[#allocation2 + $0x370] sm:$0xff] }
  0xf6   :  { %v764_v46 = vmul.f32 0.7978846, %v636_v47  ;;  %v1270_v7 = vmul.f32 %v1142_v58, %v886_v1  ;;  %v888_v21 = vmul.f32 0.5, %v2342_v9  ;;  %v637_v56 = vmul.f32 %v509_v0, %v2374_v17  ;;  %v2426_v0 = vld [vmem:[#allocation2 + $0x378] sm:$0xff] }
  0xf7   :  { %v510_v51 = vadd.f32 1.0, %v382_v60  ;;  %1397 = vst [vmem:[#allocation5 + $0x2f0] sm:$0xff] %v1269_v5  ;;  %v889_v63 = vmul.f32 0.5, %v2346_v52  ;;  %v383_v23 = vmul.f32 0.044715, %v255_v39  ;;  %v256_v12 = vmul.f32 %v2390_v11, %v2390_v11 }
  0xf8   :  { %1654 = vtanh.f32 %v764_v46  ;;  %1398 = vst [vmem:[#allocation5 + $0x2f8] sm:$0xff] %v1270_v7  ;;  %v890_v3 = vmul.f32 0.5, %v2353_v48  ;;  %v765_v49 = vmul.f32 0.7978846, %v637_v56  ;;  %v257_v9 = vmul.f32 %v2394_v29, %v2394_v29  ;;  %v2434_v56 = vld [vmem:[#allocation2 + $0x388] sm:$0xff] }
  0xf9   :  { %v638_v22 = vmul.f32 %v510_v51, %v2380_v14  ;;  %v1645_v40 = vpop.eup %1644  ;;  %v891_v13 = vmul.f32 0.5, %v2358_v16  ;;  %v511_v30 = vadd.f32 1.0, %v383_v23  ;;  %v384_v42 = vmul.f32 0.044715, %v256_v12 }
  0xfa   :  { %v258_v52 = vmul.f32 %v2398_v61, %v2398_v61  ;;  %v1647_v31 = vpop.eup %1646  ;;  %v1143_v4 = vadd.f32 1.0, %v1645_v40  ;;  %1656 = vtanh.f32 %v765_v49  ;;  %v385_v6 = vmul.f32 0.044715, %v257_v9 }
  0xfb   :  { %v766_v48 = vmul.f32 0.7978846, %v638_v22  ;;  %v1144_v54 = vadd.f32 1.0, %v1647_v31  ;;  %v639_v25 = vmul.f32 %v511_v30, %v2386_v24  ;;  %v512_v15 = vadd.f32 1.0, %v384_v42 }
  0xfc   :  { %v386_v32 = vmul.f32 0.044715, %v258_v52  ;;  %v1649_v2 = vpop.eup %1648  ;;  %v1271_v34 = vmul.f32 %v1143_v4, %v887_v45  ;;  %v513_v16 = vadd.f32 1.0, %v385_v6  ;;  %v259_v33 = vmul.f32 %v2410_v50, %v2410_v50 }
  0xfd   :  { %1658 = vtanh.f32 %v766_v48  ;;  %v1651_v53 = vpop.eup %1650  ;;  %v1272_v36 = vmul.f32 %v1144_v54, %v888_v21  ;;  %v1145_v55 = vadd.f32 1.0, %v1649_v2  ;;  %v767_v37 = vmul.f32 0.7978846, %v639_v25  ;;  %v2432_v21 = vld [vmem:[#allocation2 + $0x380] sm:$0xff] }
  0xfe   :  { %v640_v27 = vmul.f32 %v512_v15, %v2390_v11  ;;  %1399 = vst [vmem:[#allocation5 + $0x300] sm:$0xff] %v1271_v34  ;;  %v1146_v41 = vadd.f32 1.0, %v1651_v53  ;;  %v641_v57 = vmul.f32 %v513_v16, %v2394_v29  ;;  %v514_v44 = vadd.f32 1.0, %v386_v32 }
  0xff   :  { %v387_v62 = vmul.f32 0.044715, %v259_v33  ;;  %v1653_v28 = vpop.eup %1652  ;;  %1400 = vst [vmem:[#allocation5 + $0x308] sm:$0xff] %v1272_v36  ;;  %v1273_v19 = vmul.f32 %v1145_v55, %v889_v63  ;;  %v892_v20 = vmul.f32 0.5, %v2364_v43  ;;  %1660 = vtanh.f32 %v767_v37 }
 0x100   :  { %v768_v18 = vmul.f32 0.7978846, %v640_v27  ;;  %v1274_v35 = vmul.f32 %v1146_v41, %v890_v3  ;;  %v1147_v1 = vadd.f32 1.0, %v1653_v28  ;;  %v769_v38 = vmul.f32 0.7978846, %v641_v57  ;;  %v2453_v57 = vld [vmem:[#allocation2 + $0x398] sm:$0xff] }
 0x101   :  { %v642_v10 = vmul.f32 %v514_v44, %v2398_v61  ;;  %1401 = vst [vmem:[#allocation5 + $0x310] sm:$0xff] %v1273_v19  ;;  %v893_v47 = vmul.f32 0.5, %v2374_v17  ;;  %v515_v58 = vadd.f32 1.0, %v387_v62  ;;  %v260_v45 = vmul.f32 %v2417_v8, %v2417_v8 }
 0x102   :  { %v1655_v59 = vpop.eup %1654  ;;  %1662 = vtanh.f32 %v768_v18  ;;  %1402 = vst [vmem:[#allocation5 + $0x318] sm:$0xff] %v1274_v35  ;;  %v1275_v43 = vmul.f32 %v1147_v1, %v891_v13  ;;  %v894_v46 = vmul.f32 0.5, %v2380_v14  ;;  %v261_v17 = vmul.f32 %v2421_v26, %v2421_v26 }
 0x103   :  { %v1148_v60 = vadd.f32 1.0, %v1655_v59  ;;  %1664 = vtanh.f32 %v769_v38  ;;  %v770_v5 = vmul.f32 0.7978846, %v642_v10  ;;  %v643_v39 = vmul.f32 %v515_v58, %v2410_v50  ;;  %v2457_v38 = vld [vmem:[#allocation2 + $0x3a0] sm:$0xff]  ;;  %v2462_v58 = vld [vmem:[#allocation2 + $0x3a8] sm:$0xff] }
 0x104   :  { %v388_v7 = vmul.f32 0.044715, %v260_v45  ;;  %v1657_v51 = vpop.eup %1656  ;;  %1403 = vst [vmem:[#allocation5 + $0x320] sm:$0xff] %v1275_v43  ;;  %v895_v23 = vmul.f32 0.5, %v2386_v24  ;;  %v262_v12 = vmul.f32 %v2426_v0, %v2426_v0  ;;  %v389_v22 = vmul.f32 0.044715, %v261_v17 }
 0x105   :  { %v1276_v63 = vmul.f32 %v1148_v60, %v892_v20  ;;  %1666 = vtanh.f32 %v770_v5  ;;  %v1149_v14 = vadd.f32 1.0, %v1657_v51  ;;  %v771_v3 = vmul.f32 0.7978846, %v643_v39  ;;  %v2444_v24 = vld [vmem:[#allocation2 + $0x390] sm:$0xff] }
 0x106   :  { %v516_v49 = vadd.f32 1.0, %v388_v7  ;;  %v896_v40 = vmul.f32 0.5, %v2390_v11  ;;  %v390_v13 = vmul.f32 0.044715, %v262_v12  ;;  %v263_v30 = vmul.f32 %v2432_v21, %v2432_v21  ;;  %v2467_v17 = vld [vmem:[#allocation2 + $0x3b0] sm:$0xff] }
 0x107   :  { %v1659_v9 = vpop.eup %1658  ;;  %1404 = vst [vmem:[#allocation5 + $0x328] sm:$0xff] %v1276_v63  ;;  %v264_v42 = vmul.f32 %v2434_v56, %v2434_v56  ;;  %v1277_v52 = vmul.f32 %v1149_v14, %v893_v47  ;;  %1668 = vtanh.f32 %v771_v3  ;;  %v517_v48 = vadd.f32 1.0, %v389_v22 }
 0x108   :  { %v1150_v31 = vadd.f32 1.0, %v1659_v9  ;;  %v644_v4 = vmul.f32 %v516_v49, %v2417_v8  ;;  %v518_v6 = vadd.f32 1.0, %v390_v13  ;;  %v391_v54 = vmul.f32 0.044715, %v263_v30  ;;  %v2472_v49 = vld [vmem:[#allocation2 + $0x3b8] sm:$0xff]  ;;  %v2477_v30 = vld [vmem:[#allocation2 + $0x3c0] sm:$0xff] }
 0x109   :  { %v392_v25 = vmul.f32 0.044715, %v264_v42  ;;  %v1661_v15 = vpop.eup %1660  ;;  %1405 = vst [vmem:[#allocation5 + $0x330] sm:$0xff] %v1277_v52  ;;  %v897_v32 = vmul.f32 0.5, %v2394_v29  ;;  %v265_v34 = vmul.f32 %v2444_v24, %v2444_v24  ;;  %v645_v33 = vmul.f32 %v517_v48, %v2421_v26 }
 0x10a   :  { %v1278_v11 = vmul.f32 %v1150_v31, %v894_v46  ;;  %v772_v2 = vmul.f32 0.7978846, %v644_v4  ;;  %v1151_v16 = vadd.f32 1.0, %v1661_v15  ;;  %v646_v53 = vmul.f32 %v518_v6, %v2426_v0 }
 0x10b   :  { %v519_v36 = vadd.f32 1.0, %v391_v54  ;;  %v898_v37 = vmul.f32 0.5, %v2398_v61  ;;  %v520_v27 = vadd.f32 1.0, %v392_v25  ;;  %v393_v41 = vmul.f32 0.044715, %v265_v34 }
 0x10c   :  { %v1663_v55 = vpop.eup %1662  ;;  %1406 = vst [vmem:[#allocation5 + $0x338] sm:$0xff] %v1278_v11  ;;  %1670 = vtanh.f32 %v772_v2  ;;  %v1279_v44 = vmul.f32 %v1151_v16, %v895_v23  ;;  %v773_v28 = vmul.f32 0.7978846, %v645_v33  ;;  %v774_v19 = vmul.f32 0.7978846, %v646_v53  ;;  %v2488_v16 = vld [vmem:[#allocation2 + $0x3c8] sm:$0xff] }
 0x10d   :  { %v1665_v29 = vpop.eup %1664  ;;  %v1152_v62 = vadd.f32 1.0, %v1663_v55  ;;  %v647_v18 = vmul.f32 %v519_v36, %v2432_v21  ;;  %v648_v35 = vmul.f32 %v520_v27, %v2434_v56  ;;  %v521_v1 = vadd.f32 1.0, %v393_v41 }
 0x10e   :  { %v1153_v20 = vadd.f32 1.0, %v1665_v29  ;;  %1407 = vst [vmem:[#allocation5 + $0x340] sm:$0xff] %v1279_v44  ;;  %v899_v59 = vmul.f32 0.5, %v2410_v50  ;;  %1672 = vtanh.f32 %v773_v28  ;;  %v266_v47 = vmul.f32 %v2453_v57, %v2453_v57 }
 0x10f   :  { %v1667_v10 = vpop.eup %1666  ;;  %v1280_v61 = vmul.f32 %v1152_v62, %v896_v40  ;;  %1674 = vtanh.f32 %v774_v19  ;;  %v775_v60 = vmul.f32 0.7978846, %v647_v18  ;;  %v776_v5 = vmul.f32 0.7978846, %v648_v35 }
 0x110   :  { %v1281_v45 = vmul.f32 %v1153_v20, %v897_v32  ;;  %v1154_v43 = vadd.f32 1.0, %v1667_v10  ;;  %v649_v46 = vmul.f32 %v521_v1, %v2444_v24  ;;  %v394_v39 = vmul.f32 0.044715, %v266_v47  ;;  %v2495_v1 = vld [vmem:[#allocation2 + $0x3d0] sm:$0xff] }
 0x111   :  { %1408 = vst [vmem:[#allocation5 + $0x348] sm:$0xff] %v1280_v61  ;;  %v267_v7 = vmul.f32 %v2457_v38, %v2457_v38  ;;  %v1669_v50 = vpop.eup %1668  ;;  %v900_v63 = vmul.f32 0.5, %v2417_v8  ;;  %1676 = vtanh.f32 %v775_v60  ;;  %v268_v23 = vmul.f32 %v2462_v58, %v2462_v58 }
 0x112   :  { %1409 = vst [vmem:[#allocation5 + $0x350] sm:$0xff] %v1281_v45  ;;  %v1282_v51 = vmul.f32 %v1154_v43, %v898_v37  ;;  %v1155_v12 = vadd.f32 1.0, %v1669_v50  ;;  %1678 = vtanh.f32 %v776_v5  ;;  %v777_v14 = vmul.f32 0.7978846, %v649_v46  ;;  %v2499_v5 = vld [vmem:[#allocation2 + $0x3d8] sm:$0xff] }
 0x113   :  { %v522_v3 = vadd.f32 1.0, %v394_v39  ;;  %v901_v22 = vmul.f32 0.5, %v2421_v26  ;;  %v395_v9 = vmul.f32 0.044715, %v267_v7  ;;  %v396_v40 = vmul.f32 0.044715, %v268_v23 }
 0x114   :  { %1410 = vst [vmem:[#allocation5 + $0x358] sm:$0xff] %v1282_v51  ;;  %v269_v13 = vmul.f32 %v2467_v17, %v2467_v17  ;;  %v1283_v8 = vmul.f32 %v1155_v12, %v899_v59  ;;  %v902_v42 = vmul.f32 0.5, %v2426_v0  ;;  %1680 = vtanh.f32 %v777_v14  ;;  %v2504_v51 = vld [vmem:[#allocation2 + $0x3e0] sm:$0xff] }
 0x115   :  { %v650_v52 = vmul.f32 %v522_v3, %v2453_v57  ;;  %v523_v4 = vadd.f32 1.0, %v395_v9  ;;  %v524_v48 = vadd.f32 1.0, %v396_v40  ;;  %v270_v26 = vmul.f32 %v2472_v49, %v2472_v49  ;;  %v2506_v3 = vld [vmem:[#allocation2 + $0x3e8] sm:$0xff] }
 0x116   :  { %v1671_v31 = vpop.eup %1670  ;;  %v397_v6 = vmul.f32 0.044715, %v269_v13  ;;  %1411 = vst [vmem:[#allocation5 + $0x360] sm:$0xff] %v1283_v8  ;;  %v903_v25 = vmul.f32 0.5, %v2432_v21  ;;  %v271_v11 = vmul.f32 %v2477_v30, %v2477_v30  ;;  %v904_v36 = vmul.f32 0.5, %v2434_v56 }
 0x117   :  { %v1156_v54 = vadd.f32 1.0, %v1671_v31  ;;  %v778_v15 = vmul.f32 0.7978846, %v650_v52  ;;  %v651_v0 = vmul.f32 %v523_v4, %v2457_v38  ;;  %v652_v32 = vmul.f32 %v524_v48, %v2462_v58 }
 0x118   :  { %v525_v2 = vadd.f32 1.0, %v397_v6  ;;  %v398_v34 = vmul.f32 0.044715, %v270_v26  ;;  %v1673_v33 = vpop.eup %1672  ;;  %v399_v55 = vmul.f32 0.044715, %v271_v11  ;;  %v272_v19 = vmul.f32 %v2488_v16, %v2488_v16 }
 0x119   :  { %v1284_v53 = vmul.f32 %v1156_v54, %v900_v63  ;;  %1682 = vtanh.f32 %v778_v15  ;;  %v1675_v37 = vpop.eup %1674  ;;  %v1157_v21 = vadd.f32 1.0, %v1673_v33  ;;  %v779_v27 = vmul.f32 0.7978846, %v651_v0 }
 0x11a   :  { %v780_v41 = vmul.f32 0.7978846, %v652_v32  ;;  %v653_v29 = vmul.f32 %v525_v2, %v2467_v17  ;;  %v1158_v44 = vadd.f32 1.0, %v1675_v37  ;;  %v526_v62 = vadd.f32 1.0, %v398_v34  ;;  %v2523_v2 = vld [vmem:[#allocation2 + $0x3f8] sm:$0xff] }
 0x11b   :  { %1412 = vst [vmem:[#allocation5 + $0x368] sm:$0xff] %v1284_v53  ;;  %v527_v28 = vadd.f32 1.0, %v399_v55  ;;  %v1677_v20 = vpop.eup %1676  ;;  %v1285_v18 = vmul.f32 %v1157_v21, %v901_v22  ;;  %v905_v35 = vmul.f32 0.5, %v2444_v24  ;;  %1684 = vtanh.f32 %v779_v27 }
 0x11c   :  { %v781_v56 = vmul.f32 0.7978846, %v653_v29  ;;  %v1679_v10 = vpop.eup %1678  ;;  %v1286_v61 = vmul.f32 %v1158_v44, %v902_v42  ;;  %v1159_v59 = vadd.f32 1.0, %v1677_v20  ;;  %1686 = vtanh.f32 %v780_v41  ;;  %v2514_v42 = vld [vmem:[#allocation2 + $0x3f0] sm:$0xff] }
 0x11d   :  { %v654_v47 = vmul.f32 %v526_v62, %v2472_v49  ;;  %1413 = vst [vmem:[#allocation5 + $0x370] sm:$0xff] %v1285_v18  ;;  %v1160_v45 = vadd.f32 1.0, %v1679_v10  ;;  %v655_v43 = vmul.f32 %v527_v28, %v2477_v30  ;;  %v400_v60 = vmul.f32 0.044715, %v272_v19 }
 0x11e   :  { %1688 = vtanh.f32 %v781_v56  ;;  %v1681_v46 = vpop.eup %1680  ;;  %1414 = vst [vmem:[#allocation5 + $0x378] sm:$0xff] %v1286_v61  ;;  %v1287_v24 = vmul.f32 %v1159_v59, %v903_v25  ;;  %v906_v39 = vmul.f32 0.5, %v2453_v57  ;;  %v273_v50 = vmul.f32 %v2495_v1, %v2495_v1 }
 0x11f   :  { %v782_v7 = vmul.f32 0.7978846, %v654_v47  ;;  %v1288_v63 = vmul.f32 %v1160_v45, %v904_v36  ;;  %v1161_v23 = vadd.f32 1.0, %v1681_v46  ;;  %v783_v12 = vmul.f32 0.7978846, %v655_v43 }
 0x120   :  { %v528_v14 = vadd.f32 1.0, %v400_v60  ;;  %1415 = vst [vmem:[#allocation5 + $0x380] sm:$0xff] %v1287_v24  ;;  %v907_v22 = vmul.f32 0.5, %v2457_v38  ;;  %v401_v9 = vmul.f32 0.044715, %v273_v50  ;;  %v274_v57 = vmul.f32 %v2499_v5, %v2499_v5 }
 0x121   :  { %1690 = vtanh.f32 %v782_v7  ;;  %1416 = vst [vmem:[#allocation5 + $0x388] sm:$0xff] %v1288_v63  ;;  %v1289_v40 = vmul.f32 %v1161_v23, %v905_v35  ;;  %v275_v8 = vmul.f32 %v2504_v51, %v2504_v51  ;;  %v908_v31 = vmul.f32 0.5, %v2462_v58 }
 0x122   :  { %1692 = vtanh.f32 %v783_v12  ;;  %v656_v13 = vmul.f32 %v528_v14, %v2488_v16  ;;  %v529_v4 = vadd.f32 1.0, %v401_v9  ;;  %v402_v38 = vmul.f32 0.044715, %v274_v57 }
 0x123   :  { %v1683_v52 = vpop.eup %1682  ;;  %v276_v48 = vmul.f32 %v2506_v3, %v2506_v3  ;;  %1417 = vst [vmem:[#allocation5 + $0x390] sm:$0xff] %v1289_v40  ;;  %v909_v26 = vmul.f32 0.5, %v2467_v17  ;;  %v403_v25 = vmul.f32 0.044715, %v275_v8  ;;  %v277_v32 = vmul.f32 %v2514_v42, %v2514_v42 }
 0x124   :  { %v1162_v6 = vadd.f32 1.0, %v1683_v52  ;;  %v784_v54 = vmul.f32 0.7978846, %v656_v13  ;;  %v657_v15 = vmul.f32 %v529_v4, %v2495_v1  ;;  %v530_v11 = vadd.f32 1.0, %v402_v38 }
 0x125   :  { %v404_v0 = vmul.f32 0.044715, %v276_v48  ;;  %v1685_v58 = vpop.eup %1684  ;;  %v910_v33 = vmul.f32 0.5, %v2472_v49  ;;  %v531_v53 = vadd.f32 1.0, %v403_v25  ;;  %v405_v44 = vmul.f32 0.044715, %v277_v32 }
 0x126   :  { %v1290_v34 = vmul.f32 %v1162_v6, %v906_v39  ;;  %1694 = vtanh.f32 %v784_v54  ;;  %v1687_v36 = vpop.eup %1686  ;;  %v1163_v55 = vadd.f32 1.0, %v1685_v58  ;;  %v785_v17 = vmul.f32 0.7978846, %v657_v15 }
 0x127   :  { %v658_v37 = vmul.f32 %v530_v11, %v2499_v5  ;;  %v532_v21 = vadd.f32 1.0, %v404_v0  ;;  %v1164_v41 = vadd.f32 1.0, %v1687_v36  ;;  %v659_v29 = vmul.f32 %v531_v53, %v2504_v51 }
 0x128   :  { %v1689_v27 = vpop.eup %1688  ;;  %1418 = vst [vmem:[#allocation5 + $0x398] sm:$0xff] %v1290_v34  ;;  %v278_v62 = vmul.f32 %v2523_v2, %v2523_v2  ;;  %v1291_v28 = vmul.f32 %v1163_v55, %v907_v22  ;;  %1696 = vtanh.f32 %v785_v17  ;;  %v533_v56 = vadd.f32 1.0, %v405_v44 }
 0x129   :  { %v1165_v19 = vadd.f32 1.0, %v1689_v27  ;;  %v786_v49 = vmul.f32 0.7978846, %v658_v37  ;;  %v1292_v20 = vmul.f32 %v1164_v41, %v908_v31  ;;  %v787_v18 = vmul.f32 0.7978846, %v659_v29 }
 0x12a   :  { %v660_v35 = vmul.f32 %v532_v21, %v2506_v3  ;;  %1419 = vst [vmem:[#allocation5 + $0x3a0] sm:$0xff] %v1291_v28  ;;  %v911_v59 = vmul.f32 0.5, %v2477_v30  ;;  %v406_v47 = vmul.f32 0.044715, %v278_v62  ;;  %v661_v46 = vmul.f32 %v533_v56, %v2514_v42 }
 0x12b   :  { %v1691_v10 = vpop.eup %1690  ;;  %v1293_v61 = vmul.f32 %v1165_v19, %v909_v26  ;;  %1698 = vtanh.f32 %v786_v49  ;;  %1420 = vst [vmem:[#allocation5 + $0x3a8] sm:$0xff] %v1292_v20  ;;  %v912_v23 = vmul.f32 0.5, %v2488_v16  ;;  %v913_v9 = vmul.f32 0.5, %v2495_v1 }
 0x12c   :  { %v1693_v45 = vpop.eup %1692  ;;  %v1166_v43 = vadd.f32 1.0, %v1691_v10  ;;  %1700 = vtanh.f32 %v787_v18  ;;  %v788_v60 = vmul.f32 0.7978846, %v660_v35  ;;  %v534_v39 = vadd.f32 1.0, %v406_v47 }
 0x12d   :  { %1421 = vst [vmem:[#allocation5 + $0x3b0] sm:$0xff] %v1293_v61  ;;  %v1167_v24 = vadd.f32 1.0, %v1693_v45  ;;  %v789_v50 = vmul.f32 0.7978846, %v661_v46  ;;  %v914_v8 = vmul.f32 0.5, %v2499_v5  ;;  %v915_v16 = vmul.f32 0.5, %v2504_v51 }
 0x12e   :  { %v1294_v7 = vmul.f32 %v1166_v43, %v910_v33  ;;  %1702 = vtanh.f32 %v788_v60  ;;  %v662_v30 = vmul.f32 %v534_v39, %v2523_v2  ;;  %v916_v6 = vmul.f32 0.5, %v2506_v3 }
 0x12f   :  { %v1295_v63 = vmul.f32 %v1167_v24, %v911_v59  ;;  %1704 = vtanh.f32 %v789_v50  ;;  %v917_v15 = vmul.f32 0.5, %v2514_v42  ;;  %v918_v51 = vmul.f32 0.5, %v2523_v2 }
 0x130   :  { %v1695_v12 = vpop.eup %1694  ;;  %1422 = vst [vmem:[#allocation5 + $0x3b8] sm:$0xff] %v1294_v7  ;;  %v790_v22 = vmul.f32 0.7978846, %v662_v30 }
 0x131   :  { %1423 = vst [vmem:[#allocation5 + $0x3c0] sm:$0xff] %v1295_v63  ;;  %v1168_v14 = vadd.f32 1.0, %v1695_v12 }
 0x132   :  { %v1697_v57 = vpop.eup %1696  ;;  %1706 = vtanh.f32 %v790_v22 }
 0x133   :  { %v1296_v40 = vmul.f32 %v1168_v14, %v912_v23  ;;  %v1169_v13 = vadd.f32 1.0, %v1697_v57 }
 0x135   :  { %v1699_v52 = vpop.eup %1698  ;;  %1424 = vst [vmem:[#allocation5 + $0x3c8] sm:$0xff] %v1296_v40  ;;  %v1297_v4 = vmul.f32 %v1169_v13, %v913_v9 }
 0x136   :  { %v1701_v31 = vpop.eup %1700  ;;  %v1170_v38 = vadd.f32 1.0, %v1699_v52 }
 0x137   :  { %v1171_v48 = vadd.f32 1.0, %v1701_v31  ;;  %1425 = vst [vmem:[#allocation5 + $0x3d0] sm:$0xff] %v1297_v4 }
 0x138   :  { %v1703_v26 = vpop.eup %1702  ;;  %v1298_v54 = vmul.f32 %v1170_v38, %v914_v8 }
 0x139   :  { %v1299_v1 = vmul.f32 %v1171_v48, %v915_v16  ;;  %v1172_v25 = vadd.f32 1.0, %v1703_v26  ;;  %v1705_v11 = vpop.eup %1704 }
 0x13a   :  { %1426 = vst [vmem:[#allocation5 + $0x3d8] sm:$0xff] %v1298_v54  ;;  %v1173_v0 = vadd.f32 1.0, %v1705_v11 }
 0x13b   :  { %1427 = vst [vmem:[#allocation5 + $0x3e0] sm:$0xff] %v1299_v1  ;;  %v1300_v5 = vmul.f32 %v1172_v25, %v916_v6 }
 0x13c   :  { %v1707_v32 = vpop.eup %1706  ;;  %v1301_v58 = vmul.f32 %v1173_v0, %v917_v15 }
 0x13d   :  { %1428 = vst [vmem:[#allocation5 + $0x3e8] sm:$0xff] %v1300_v5  ;;  %v1174_v3 = vadd.f32 1.0, %v1707_v32 }
 0x13e   :  { %1429 = vst [vmem:[#allocation5 + $0x3f0] sm:$0xff] %v1301_v58 }
 0x13f   :  { %v1302_v34 = vmul.f32 %v1174_v3, %v918_v51 }
 0x141   :  { %1430 = vst [vmem:[#allocation5 + $0x3f8] sm:$0xff] %v1302_v34 }
 0x142   :  { %1741 = shalt.err (!%p1738_p12)
}
 0x143   :  { %s1742_s24 = scalar_lea.hbm %s2557_s1, 16384 }
 0x144   :  { %p1743_p13 = scmp.ne.s32.totalorder %s2557_s1, %s1742_s24  ;;  %p1746_p0 = scmp.lt.u32.totalorder %s1742_s24, %s2557_s1 }
 0x146   :  { %p1748_p1 = pnand %p1746_p0, %p1743_p13 }
 0x148   :  { %1751 = shalt.err (!%p1748_p1)
}
 0x149   :  { %1442 = dma.vmem_to_hbm [thread:$0]  %s1437_s20, 16384, %s2557_s1, [#allocation4], %s1757_s16, %s1757_s16, %s1758_s17  }
 0x14a   :  { %1754 = dma.done.wait [#allocation4], 16384  }
 0x14b   :  { %1755 = vsyncadd [#allocation4], 4294950912 }
 0x14c   :  { %1446 = vsyncpa [#allocation3], 1 }
 0x14d   :  { %1447 = vsyncpa [#allocation4], 1 }

</bundles_post_ra>
